<compile_context>
chip_gen: v6e
topology: v6e:2x2x1
jax: 0.10.0
libtpu: 0.0.40
codegen_flags: <defaults>
</compile_context>

<pallas_src>
import jax
import jax.numpy as jnp
from jax.experimental import pallas as pl
from jax.experimental.pallas import tpu as pltpu


def _gelu_tanh(x):
    # GELU, tanh approximation (torch.nn.GELU(approximate='tanh')).
    return 0.5 * x * (1.0 + jnp.tanh(0.7978845608028654 * (x + 0.044715 * x * x * x)))


# ---------------------------------------------------------------------------
# Fused kernel: conv1(1x1)+GELU -> depthwise 3x3 s2 p1 + GELU -> conv3(1x1)
# ---------------------------------------------------------------------------
def _fused_patch_merging_kernel(x_ref, xh_ref, w1_ref, b1_ref, w2_ref, b2_ref,
                                w3_ref, b3_ref, o_ref):
    # Per grid step (b, t):
    #   x_ref  : (1, TRo, 2, Wo, 2*Cin)  input rows [2*t*TRo, 2*(t+1)*TRo),
    #                                    axis2 = row parity, lanes = col-pair * Cin
    #   xh_ref : (1, 1,  1, Wo, 2*Cin)   input row 2*t*TRo - 1 (top halo)
    #   w1_ref : (2*Cin, 2*C)            block-diag packed 1x1 conv weight
    #   b1_ref : (1, 2*C)
    #   w2_ref : (9, C)                  depthwise taps, index = ky*3 + kx
    #   b2_ref : (1, C)
    #   w3_ref : (C, C)
    #   b3_ref : (1, C)
    #   o_ref  : (1, TRo, Wo, C)         output rows [t*TRo, (t+1)*TRo)
    t = pl.program_id(1)
    TRo = o_ref.shape[1]
    Wo = o_ref.shape[2]
    C = o_ref.shape[3]
    Cin2 = x_ref.shape[4]
    C2 = w1_ref.shape[1]          # == 2*C

    w1 = w1_ref[...]
    b1 = b1_ref[...]

    def conv1(v2d):               # (M, 2*Cin) -> (M, 2*C), GELU applied
        y = jnp.dot(v2d, w1, preferred_element_type=jnp.float32) + b1
        return _gelu_tanh(y)

    xv = x_ref[0].astype(jnp.float32)                     # (TRo, 2, Wo, 2*Cin)
    x_even = xv[:, 0, :, :].reshape(TRo * Wo, Cin2)       # input rows 2r
    x_odd = xv[:, 1, :, :].reshape(TRo * Wo, Cin2)        # input rows 2r+1
    x_halo = xh_ref[0, 0, 0].astype(jnp.float32)          # (Wo, 2*Cin), row 2*t*TRo - 1

    y_even = conv1(x_even).reshape(TRo, Wo, C2)           # conv1 @ rows 2r
    y_odd = conv1(x_odd).reshape(TRo, Wo, C2)             # conv1 @ rows 2r+1
    # Top halo: for t == 0 this is conv2's zero-padding row -> force to zero.
    y_halo = (conv1(x_halo) * (t > 0).astype(jnp.float32)).reshape(1, Wo, C2)

    # Output row r consumes conv1 rows 2r-1, 2r, 2r+1 (ky = 0, 1, 2).
    y_up = jnp.concatenate([y_halo, y_odd], axis=0)       # y_up[r] = conv1 row 2r-1
    row_sets = (y_up[:TRo], y_even, y_up[1:TRo + 1])      # ky = 0, 1, 2

    zero_col = jnp.zeros((TRo, 1, C), jnp.float32)
    acc = None
    for ky in range(3):
        a = row_sets[ky]                                  # (TRo, Wo, 2*C)
        center = a[:, :, :C]                              # input col 2c   (kx = 1)
        right = a[:, :, C:]                               # input col 2c+1 (kx = 2)
        # input col 2c-1 (kx = 0): odd column of the previous packed column,
        # with conv2's left zero-padding at c == 0.
        left = jnp.concatenate([zero_col, right[:, :Wo - 1, :]], axis=1)
        for kx, tap in ((0, left), (1, center), (2, right)):
            term = tap * w2_ref[ky * 3 + kx][None, None, :]
            acc = term if acc is None else acc + term
    z = _gelu_tanh(acc + b2_ref[...])                     # (TRo, Wo, C)

    out = jnp.dot(z.reshape(TRo * Wo, C), w3_ref[...],
                  preferred_element_type=jnp.float32) + b3_ref[...]
    o_ref[0] = out.reshape(TRo, Wo, C).astype(o_ref.dtype)


def _pick_row_tile(Ho, Wo, Cin, C, budget_bytes=4 << 20):
    """Largest output-row tile that (a) divides Ho, (b) keeps the per-step VMEM
    footprint small (safe for v7x's 64 MiB VMEM with double buffering), and
    (c) leaves >= 2 row tiles so both v7x TensorCores always have work."""
    def step_bytes(tro):
        in_blk = tro * 2 * Wo * 2 * Cin * 4
        out_blk = tro * Wo * C * 4
        acts = (2 * tro + 1) * Wo * 2 * C * 4 * 2     # conv1 outputs + tap temporaries
        return 2 * (in_blk + out_blk) + acts          # 2x for double buffering
    divisors = [d for d in range(1, Ho + 1) if Ho % d == 0]
    candidates = [d for d in divisors if d < Ho] or [Ho]
    fitting = [d for d in candidates if step_bytes(d) <= budget_bytes]
    return max(fitting) if fitting else min(candidates)


def patch_merging_forward(x, params, input_resolution, *, row_tile=None,
                          vmem_limit_bytes=32 * 1024 * 1024):
    w1p, b1p, w2, b2, w3, b3 = params
    B, N, Cin = x.shape
    H, W = input_resolution
    assert N == H * W, (N, H, W)
    assert H % 2 == 0 and W % 2 == 0, "PatchMerging expects an even input resolution"
    Ho, Wo = H // 2, W // 2
    C = w3.shape[0]

    # Free (metadata-only) reshape: (B, H*W, Cin) -> (B, Ho, 2, Wo, 2*Cin).
    x5 = x.reshape(B, Ho, 2, Wo, 2 * Cin)

    TRo = row_tile if row_tile is not None else _pick_row_tile(Ho, Wo, Cin, C)
    assert Ho % TRo == 0, (Ho, TRo)
    n_tiles = Ho // TRo

    out = pl.pallas_call(
        _fused_patch_merging_kernel,
        out_shape=jax.ShapeDtypeStruct((B, Ho, Wo, C), jnp.float32),
        grid=(B, n_tiles),
        in_specs=[
            # main input strip: rows [2*t*TRo, 2*(t+1)*TRo)
            pl.BlockSpec((1, TRo, 2, Wo, 2 * Cin), lambda b, t: (b, t, 0, 0, 0)),
            # 1-row top halo: input row 2*t*TRo - 1 (clamped; zeroed in-kernel at t==0)
            pl.BlockSpec((1, 1, 1, Wo, 2 * Cin),
                         lambda b, t: (b, jnp.maximum(t * TRo - 1, 0), 1, 0, 0)),
            # weights: constant index_maps -> stay resident in VMEM
            pl.BlockSpec((2 * Cin, 2 * C), lambda b, t: (0, 0)),
            pl.BlockSpec((1, 2 * C), lambda b, t: (0, 0)),
            pl.BlockSpec((9, C), lambda b, t: (0, 0)),
            pl.BlockSpec((1, C), lambda b, t: (0, 0)),
            pl.BlockSpec((C, C), lambda b, t: (0, 0)),
            pl.BlockSpec((1, C), lambda b, t: (0, 0)),
        ],
        out_specs=pl.BlockSpec((1, TRo, Wo, C), lambda b, t: (b, t, 0, 0)),
        compiler_params=pltpu.CompilerParams(
            dimension_semantics=("parallel", "parallel"),
            vmem_limit_bytes=vmem_limit_bytes),
    )(x5, x5, w1p, b1p, w2, b2, w3, b3)
    return out.reshape(B, Ho * Wo, C)


# ---------------------------------------------------------------------------
# Module wrapper (parameters built deterministically in-script)
# ---------------------------------------------------------------------------
class PatchMergingPallas:
    def __init__(self, input_resolution, dim, out_dim, key):
        self.input_resolution = input_resolution
        self.dim = dim
        self.out_dim = out_dim
        k1, k2, k3 = jax.random.split(key, 3)
        # PyTorch Conv2d weight shapes (bias=False):
        w1 = jax.random.normal(k1, (out_dim, dim, 1, 1), jnp.float32) * (1.0 / dim ** 0.5)
        w2 = jax.random.normal(k2, (out_dim, 1, 3, 3), jnp.float32) * (1.0 / 3.0)
        w3 = jax.random.normal(k3, (out_dim, out_dim, 1, 1), jnp.float32) * (1.0 / out_dim ** 0.5)

        # BatchNorm as set by Conv2d_BN.__init__ (gamma=1, beta=0, mean=0, var=1), fused.
        eps = 1e-5

        def fuse(w):
            cout = w.shape[0]
            gamma = jnp.ones((cout,), jnp.float32)
            beta = jnp.zeros((cout,), jnp.float32)
            mean = jnp.zeros((cout,), jnp.float32)
            var = jnp.ones((cout,), jnp.float32)
            scale = gamma / jnp.sqrt(var + eps)
            return w * scale[:, None, None, None], beta - mean * scale

        w1f, b1 = fuse(w1)
        w2f, b2 = fuse(w2)
        w3f, b3 = fuse(w3)

        # Plain layouts (used by the pure-JAX reference).
        self.w1 = w1f.reshape(out_dim, dim).T          # (dim, out_dim)
        self.b1 = b1
        self.w2 = w2f.reshape(out_dim, 9).T            # (9, out_dim), tap = ky*3 + kx
        self.b2 = b2
        self.w3 = w3f.reshape(out_dim, out_dim).T      # (out_dim, out_dim)
        self.b3 = b3

        # Kernel layouts: column-pair-packed (lane-dense) 1x1 conv = block_diag(W1, W1).
        w1p = jnp.zeros((2 * dim, 2 * out_dim), jnp.float32)
        w1p = w1p.at[:dim, :out_dim].set(self.w1).at[dim:, out_dim:].set(self.w1)
        self.w1p = w1p
        self.b1p = jnp.concatenate([b1, b1]).reshape(1, 2 * out_dim)
        self.b2r = b2.reshape(1, out_dim)
        self.b3r = b3.reshape(1, out_dim)

    def __call__(self, x, row_tile=None):
        # Matches the 3-D input branch of PatchMerging.forward.
        B, N, Cin = x.shape
        assert Cin == self.dim and N == self.input_resolution[0] * self.input_resolution[1]
        return patch_merging_forward(
            x, (self.w1p, self.b1p, self.w2, self.b2r, self.w3, self.b3r),
            self.input_resolution, row_tile=row_tile)


def reference_forward(x, pm):
    """Pure-JAX reference of the same forward pass (correctness check)."""
    H, W = pm.input_resolution
    B = x.shape[0]
    hp = jax.lax.Precision.HIGHEST
    x4 = x.reshape(B, H, W, pm.dim)
    y = jnp.einsum("bhwc,co->bhwo", x4, pm.w1, precision=hp) + pm.b1
    y = _gelu_tanh(y)
    y = jax.lax.conv_general_dilated(
        y,
        pm.w2.reshape(3, 3, 1, pm.out_dim),
        window_strides=(2, 2),
        padding=[(1, 1), (1, 1)],
        dimension_numbers=("NHWC", "HWIO", "NHWC"),
        feature_group_count=pm.out_dim,
        precision=hp,
    ) + pm.b2
    y = _gelu_tanh(y)
    y = jnp.einsum("bhwc,co->bhwo", y, pm.w3, precision=hp) + pm.b3
    return y.reshape(B, -1, pm.out_dim)


if __name__ == "__main__":
    key = jax.random.PRNGKey(0)
    kparam, kx = jax.random.split(key)

    B, H, W, dim, out_dim = 2, 16, 16, 32, 64
    pm = PatchMergingPallas((H, W), dim, out_dim, kparam)

    x = jax.random.normal(kx, (B, H * W, dim), jnp.float32)

    out = jax.block_until_ready(pm(x))
    assert out.shape == (B, (H // 2) * (W // 2), out_dim), out.shape

    ref = reference_forward(x, pm)
    err = float(jnp.max(jnp.abs(out - ref)))
    assert err < 1e-3, f"max abs error {err}"

    print("KERNEL_OK")
</pallas_src>

<mosaic_0001>
module attributes {stable_mosaic.version = 11 : i64} {
  func.func @_fused_patch_merging_kernel(%arg0: i32, %arg1: i32, %arg2: memref<1x4x2x8x64xf32, #tpu.memory_space<vmem>>, %arg3: memref<1x1x1x8x64xf32, #tpu.memory_space<vmem>>, %arg4: memref<64x128xf32, #tpu.memory_space<vmem>>, %arg5: memref<1x128xf32, #tpu.memory_space<vmem>>, %arg6: memref<9x64xf32, #tpu.memory_space<vmem>>, %arg7: memref<1x64xf32, #tpu.memory_space<vmem>>, %arg8: memref<64x64xf32, #tpu.memory_space<vmem>>, %arg9: memref<1x64xf32, #tpu.memory_space<vmem>>, %arg10: memref<1x4x8x64xf32, #tpu.memory_space<vmem>>) attributes {dimension_semantics = [#tpu.dimension_semantics<parallel>, #tpu.dimension_semantics<parallel>], iteration_bounds = array<i64: 2, 2>, scalar_prefetch = 0 : i64, scratch_operands = 0 : i64, tpu.core_type = #tpu.core_type<tc>, window_params = [{transform_indices = @transform_0, window_bounds = array<i64: 1, 4, 2, 8, 64>}, {transform_indices = @transform_1, window_bounds = array<i64: 1, 1, 1, 8, 64>}, {pipeline_mode = #tpu.pipeline_mode<synchronous>, transform_indices = @transform_2, window_bounds = array<i64: 64, 128>}, {pipeline_mode = #tpu.pipeline_mode<synchronous>, transform_indices = @transform_3, window_bounds = array<i64: 1, 128>}, {pipeline_mode = #tpu.pipeline_mode<synchronous>, transform_indices = @transform_4, window_bounds = array<i64: 9, 64>}, {pipeline_mode = #tpu.pipeline_mode<synchronous>, transform_indices = @transform_5, window_bounds = array<i64: 1, 64>}, {pipeline_mode = #tpu.pipeline_mode<synchronous>, transform_indices = @transform_6, window_bounds = array<i64: 64, 64>}, {pipeline_mode = #tpu.pipeline_mode<synchronous>, transform_indices = @transform_7, window_bounds = array<i64: 1, 64>}, {transform_indices = @transform_8, window_bounds = array<i64: 1, 4, 8, 64>}]} {
    %c0 = arith.constant 0 : index
    %c0_0 = arith.constant 0 : index
    %0 = vector.load %arg4[%c0, %c0_0] : memref<64x128xf32, #tpu.memory_space<vmem>>, vector<64x128xf32>
    %c0_1 = arith.constant 0 : index
    %c0_2 = arith.constant 0 : index
    %1 = vector.load %arg5[%c0_1, %c0_2] : memref<1x128xf32, #tpu.memory_space<vmem>>, vector<1x128xf32>
    %c0_3 = arith.constant 0 : index
    %c0_4 = arith.constant 0 : index
    %c0_5 = arith.constant 0 : index
    %c0_6 = arith.constant 0 : index
    %c0_7 = arith.constant 0 : index
    %2 = vector.load %arg2[%c0_3, %c0_4, %c0_5, %c0_6, %c0_7] : memref<1x4x2x8x64xf32, #tpu.memory_space<vmem>>, vector<1x4x2x8x64xf32>
    %3 = vector.shape_cast %2 : vector<1x4x2x8x64xf32> to vector<4x2x8x64xf32>
    %4 = vector.extract_strided_slice %3 {offsets = [0, 0, 0, 0], sizes = [4, 1, 8, 64], strides = [1, 1, 1, 1]} : vector<4x2x8x64xf32> to vector<4x1x8x64xf32>
    %5 = vector.shape_cast %4 : vector<4x1x8x64xf32> to vector<4x8x64xf32>
    %6 = vector.shape_cast %5 : vector<4x8x64xf32> to vector<32x64xf32>
    %7 = vector.extract_strided_slice %3 {offsets = [0, 1, 0, 0], sizes = [4, 1, 8, 64], strides = [1, 1, 1, 1]} : vector<4x2x8x64xf32> to vector<4x1x8x64xf32>
    %8 = vector.shape_cast %7 : vector<4x1x8x64xf32> to vector<4x8x64xf32>
    %9 = vector.shape_cast %8 : vector<4x8x64xf32> to vector<32x64xf32>
    %c0_8 = arith.constant 0 : index
    %c0_9 = arith.constant 0 : index
    %c0_10 = arith.constant 0 : index
    %c0_11 = arith.constant 0 : index
    %c0_12 = arith.constant 0 : index
    %10 = vector.load %arg3[%c0_8, %c0_9, %c0_10, %c0_11, %c0_12] : memref<1x1x1x8x64xf32, #tpu.memory_space<vmem>>, vector<1x1x1x8x64xf32>
    %11 = vector.shape_cast %10 : vector<1x1x1x8x64xf32> to vector<8x64xf32>
    %cst = arith.constant dense<0.000000e+00> : vector<32x128xf32>
    %12 = tpu.matmul %6, %0, %cst {dimension_numbers = #tpu.dot_dimension_numbers<[1], [0], [0], [1], [0, 0, 1, 1], [], []>} : vector<32x64xf32>, vector<64x128xf32>, vector<32x128xf32> -> vector<32x128xf32>
    %13 = vector.broadcast %1 : vector<1x128xf32> to vector<32x128xf32>
    %14 = arith.addf %12, %13 : vector<32x128xf32>
    %cst_13 = arith.constant 5.000000e-01 : f32
    %15 = vector.broadcast %cst_13 : f32 to vector<32x128xf32>
    %16 = arith.mulf %15, %14 : vector<32x128xf32>
    %cst_14 = arith.constant 4.471500e-02 : f32
    %17 = vector.broadcast %cst_14 : f32 to vector<32x128xf32>
    %18 = arith.mulf %17, %14 : vector<32x128xf32>
    %19 = arith.mulf %18, %14 : vector<32x128xf32>
    %20 = arith.mulf %19, %14 : vector<32x128xf32>
    %21 = arith.addf %14, %20 : vector<32x128xf32>
    %cst_15 = arith.constant 0.797884583 : f32
    %22 = vector.broadcast %cst_15 : f32 to vector<32x128xf32>
    %23 = arith.mulf %22, %21 : vector<32x128xf32>
    %24 = math.tanh %23 : vector<32x128xf32>
    %cst_16 = arith.constant 1.000000e+00 : f32
    %25 = vector.broadcast %cst_16 : f32 to vector<32x128xf32>
    %26 = arith.addf %25, %24 : vector<32x128xf32>
    %27 = arith.mulf %16, %26 : vector<32x128xf32>
    %28 = vector.shape_cast %27 : vector<32x128xf32> to vector<4x8x128xf32>
    %cst_17 = arith.constant dense<0.000000e+00> : vector<32x128xf32>
    %29 = tpu.matmul %9, %0, %cst_17 {dimension_numbers = #tpu.dot_dimension_numbers<[1], [0], [0], [1], [0, 0, 1, 1], [], []>} : vector<32x64xf32>, vector<64x128xf32>, vector<32x128xf32> -> vector<32x128xf32>
    %30 = vector.broadcast %1 : vector<1x128xf32> to vector<32x128xf32>
    %31 = arith.addf %29, %30 : vector<32x128xf32>
    %cst_18 = arith.constant 5.000000e-01 : f32
    %32 = vector.broadcast %cst_18 : f32 to vector<32x128xf32>
    %33 = arith.mulf %32, %31 : vector<32x128xf32>
    %cst_19 = arith.constant 4.471500e-02 : f32
    %34 = vector.broadcast %cst_19 : f32 to vector<32x128xf32>
    %35 = arith.mulf %34, %31 : vector<32x128xf32>
    %36 = arith.mulf %35, %31 : vector<32x128xf32>
    %37 = arith.mulf %36, %31 : vector<32x128xf32>
    %38 = arith.addf %31, %37 : vector<32x128xf32>
    %cst_20 = arith.constant 0.797884583 : f32
    %39 = vector.broadcast %cst_20 : f32 to vector<32x128xf32>
    %40 = arith.mulf %39, %38 : vector<32x128xf32>
    %41 = math.tanh %40 : vector<32x128xf32>
    %cst_21 = arith.constant 1.000000e+00 : f32
    %42 = vector.broadcast %cst_21 : f32 to vector<32x128xf32>
    %43 = arith.addf %42, %41 : vector<32x128xf32>
    %44 = arith.mulf %33, %43 : vector<32x128xf32>
    %45 = vector.shape_cast %44 : vector<32x128xf32> to vector<4x8x128xf32>
    %cst_22 = arith.constant dense<0.000000e+00> : vector<8x128xf32>
    %46 = tpu.matmul %11, %0, %cst_22 {dimension_numbers = #tpu.dot_dimension_numbers<[1], [0], [0], [1], [0, 0, 1, 1], [], []>} : vector<8x64xf32>, vector<64x128xf32>, vector<8x128xf32> -> vector<8x128xf32>
    %47 = vector.broadcast %1 : vector<1x128xf32> to vector<8x128xf32>
    %48 = arith.addf %46, %47 : vector<8x128xf32>
    %cst_23 = arith.constant 5.000000e-01 : f32
    %49 = vector.broadcast %cst_23 : f32 to vector<8x128xf32>
    %50 = arith.mulf %49, %48 : vector<8x128xf32>
    %cst_24 = arith.constant 4.471500e-02 : f32
    %51 = vector.broadcast %cst_24 : f32 to vector<8x128xf32>
    %52 = arith.mulf %51, %48 : vector<8x128xf32>
    %53 = arith.mulf %52, %48 : vector<8x128xf32>
    %54 = arith.mulf %53, %48 : vector<8x128xf32>
    %55 = arith.addf %48, %54 : vector<8x128xf32>
    %cst_25 = arith.constant 0.797884583 : f32
    %56 = vector.broadcast %cst_25 : f32 to vector<8x128xf32>
    %57 = arith.mulf %56, %55 : vector<8x128xf32>
    %58 = math.tanh %57 : vector<8x128xf32>
    %cst_26 = arith.constant 1.000000e+00 : f32
    %59 = vector.broadcast %cst_26 : f32 to vector<8x128xf32>
    %60 = arith.addf %59, %58 : vector<8x128xf32>
    %61 = arith.mulf %50, %60 : vector<8x128xf32>
    %c0_i32 = arith.constant 0 : i32
    %62 = arith.cmpi sgt, %arg1, %c0_i32 : i32
    %63 = arith.extui %62 : i1 to i32
    %64 = arith.sitofp %63 : i32 to f32
    %65 = vector.broadcast %64 : f32 to vector<8x128xf32>
    %66 = arith.mulf %61, %65 : vector<8x128xf32>
    %67 = vector.shape_cast %66 : vector<8x128xf32> to vector<1x8x128xf32>
    %68 = tpu.concatenate %67, %45 in 0 : vector<1x8x128xf32>, vector<4x8x128xf32> -> vector<5x8x128xf32>
    %69 = vector.extract_strided_slice %68 {offsets = [0, 0, 0], sizes = [4, 8, 128], strides = [1, 1, 1]} : vector<5x8x128xf32> to vector<4x8x128xf32>
    %70 = vector.extract_strided_slice %68 {offsets = [1, 0, 0], sizes = [4, 8, 128], strides = [1, 1, 1]} : vector<5x8x128xf32> to vector<4x8x128xf32>
    %cst_27 = arith.constant 0.000000e+00 : f32
    %71 = vector.broadcast %cst_27 : f32 to vector<4x1x64xf32>
    %72 = vector.extract_strided_slice %69 {offsets = [0, 0, 0], sizes = [4, 8, 64], strides = [1, 1, 1]} : vector<4x8x128xf32> to vector<4x8x64xf32>
    %73 = vector.extract_strided_slice %69 {offsets = [0, 0, 64], sizes = [4, 8, 64], strides = [1, 1, 1]} : vector<4x8x128xf32> to vector<4x8x64xf32>
    %74 = vector.extract_strided_slice %73 {offsets = [0, 0, 0], sizes = [4, 7, 64], strides = [1, 1, 1]} : vector<4x8x64xf32> to vector<4x7x64xf32>
    %75 = tpu.concatenate %71, %74 in 1 : vector<4x1x64xf32>, vector<4x7x64xf32> -> vector<4x8x64xf32>
    %c0_28 = arith.constant 0 : index
    %c0_29 = arith.constant 0 : index
    %76 = vector.load %arg6[%c0_28, %c0_29] : memref<9x64xf32, #tpu.memory_space<vmem>>, vector<1x64xf32>
    %77 = vector.shape_cast %76 : vector<1x64xf32> to vector<64xf32>
    %78 = vector.shape_cast %77 : vector<64xf32> to vector<1x1x64xf32>
    %79 = vector.broadcast %78 : vector<1x1x64xf32> to vector<4x8x64xf32>
    %80 = arith.mulf %75, %79 : vector<4x8x64xf32>
    %c1 = arith.constant 1 : index
    %c0_30 = arith.constant 0 : index
    %81 = vector.load %arg6[%c1, %c0_30] : memref<9x64xf32, #tpu.memory_space<vmem>>, vector<1x64xf32>
    %82 = vector.shape_cast %81 : vector<1x64xf32> to vector<64xf32>
    %83 = vector.shape_cast %82 : vector<64xf32> to vector<1x1x64xf32>
    %84 = vector.broadcast %83 : vector<1x1x64xf32> to vector<4x8x64xf32>
    %85 = arith.mulf %72, %84 : vector<4x8x64xf32>
    %86 = arith.addf %80, %85 : vector<4x8x64xf32>
    %c2 = arith.constant 2 : index
    %c0_31 = arith.constant 0 : index
    %87 = vector.load %arg6[%c2, %c0_31] : memref<9x64xf32, #tpu.memory_space<vmem>>, vector<1x64xf32>
    %88 = vector.shape_cast %87 : vector<1x64xf32> to vector<64xf32>
    %89 = vector.shape_cast %88 : vector<64xf32> to vector<1x1x64xf32>
    %90 = vector.broadcast %89 : vector<1x1x64xf32> to vector<4x8x64xf32>
    %91 = arith.mulf %73, %90 : vector<4x8x64xf32>
    %92 = arith.addf %86, %91 : vector<4x8x64xf32>
    %93 = vector.extract_strided_slice %28 {offsets = [0, 0, 0], sizes = [4, 8, 64], strides = [1, 1, 1]} : vector<4x8x128xf32> to vector<4x8x64xf32>
    %94 = vector.extract_strided_slice %28 {offsets = [0, 0, 64], sizes = [4, 8, 64], strides = [1, 1, 1]} : vector<4x8x128xf32> to vector<4x8x64xf32>
    %95 = vector.extract_strided_slice %94 {offsets = [0, 0, 0], sizes = [4, 7, 64], strides = [1, 1, 1]} : vector<4x8x64xf32> to vector<4x7x64xf32>
    %96 = tpu.concatenate %71, %95 in 1 : vector<4x1x64xf32>, vector<4x7x64xf32> -> vector<4x8x64xf32>
    %c3 = arith.constant 3 : index
    %c0_32 = arith.constant 0 : index
    %97 = vector.load %arg6[%c3, %c0_32] : memref<9x64xf32, #tpu.memory_space<vmem>>, vector<1x64xf32>
    %98 = vector.shape_cast %97 : vector<1x64xf32> to vector<64xf32>
    %99 = vector.shape_cast %98 : vector<64xf32> to vector<1x1x64xf32>
    %100 = vector.broadcast %99 : vector<1x1x64xf32> to vector<4x8x64xf32>
    %101 = arith.mulf %96, %100 : vector<4x8x64xf32>
    %102 = arith.addf %92, %101 : vector<4x8x64xf32>
    %c4 = arith.constant 4 : index
    %c0_33 = arith.constant 0 : index
    %103 = vector.load %arg6[%c4, %c0_33] : memref<9x64xf32, #tpu.memory_space<vmem>>, vector<1x64xf32>
    %104 = vector.shape_cast %103 : vector<1x64xf32> to vector<64xf32>
    %105 = vector.shape_cast %104 : vector<64xf32> to vector<1x1x64xf32>
    %106 = vector.broadcast %105 : vector<1x1x64xf32> to vector<4x8x64xf32>
    %107 = arith.mulf %93, %106 : vector<4x8x64xf32>
    %108 = arith.addf %102, %107 : vector<4x8x64xf32>
    %c5 = arith.constant 5 : index
    %c0_34 = arith.constant 0 : index
    %109 = vector.load %arg6[%c5, %c0_34] : memref<9x64xf32, #tpu.memory_space<vmem>>, vector<1x64xf32>
    %110 = vector.shape_cast %109 : vector<1x64xf32> to vector<64xf32>
    %111 = vector.shape_cast %110 : vector<64xf32> to vector<1x1x64xf32>
    %112 = vector.broadcast %111 : vector<1x1x64xf32> to vector<4x8x64xf32>
    %113 = arith.mulf %94, %112 : vector<4x8x64xf32>
    %114 = arith.addf %108, %113 : vector<4x8x64xf32>
    %115 = vector.extract_strided_slice %70 {offsets = [0, 0, 0], sizes = [4, 8, 64], strides = [1, 1, 1]} : vector<4x8x128xf32> to vector<4x8x64xf32>
    %116 = vector.extract_strided_slice %70 {offsets = [0, 0, 64], sizes = [4, 8, 64], strides = [1, 1, 1]} : vector<4x8x128xf32> to vector<4x8x64xf32>
    %117 = vector.extract_strided_slice %116 {offsets = [0, 0, 0], sizes = [4, 7, 64], strides = [1, 1, 1]} : vector<4x8x64xf32> to vector<4x7x64xf32>
    %118 = tpu.concatenate %71, %117 in 1 : vector<4x1x64xf32>, vector<4x7x64xf32> -> vector<4x8x64xf32>
    %c6 = arith.constant 6 : index
    %c0_35 = arith.constant 0 : index
    %119 = vector.load %arg6[%c6, %c0_35] : memref<9x64xf32, #tpu.memory_space<vmem>>, vector<1x64xf32>
    %120 = vector.shape_cast %119 : vector<1x64xf32> to vector<64xf32>
    %121 = vector.shape_cast %120 : vector<64xf32> to vector<1x1x64xf32>
    %122 = vector.broadcast %121 : vector<1x1x64xf32> to vector<4x8x64xf32>
    %123 = arith.mulf %118, %122 : vector<4x8x64xf32>
    %124 = arith.addf %114, %123 : vector<4x8x64xf32>
    %c7 = arith.constant 7 : index
    %c0_36 = arith.constant 0 : index
    %125 = vector.load %arg6[%c7, %c0_36] : memref<9x64xf32, #tpu.memory_space<vmem>>, vector<1x64xf32>
    %126 = vector.shape_cast %125 : vector<1x64xf32> to vector<64xf32>
    %127 = vector.shape_cast %126 : vector<64xf32> to vector<1x1x64xf32>
    %128 = vector.broadcast %127 : vector<1x1x64xf32> to vector<4x8x64xf32>
    %129 = arith.mulf %115, %128 : vector<4x8x64xf32>
    %130 = arith.addf %124, %129 : vector<4x8x64xf32>
    %c8 = arith.constant 8 : index
    %c0_37 = arith.constant 0 : index
    %131 = vector.load %arg6[%c8, %c0_37] : memref<9x64xf32, #tpu.memory_space<vmem>>, vector<1x64xf32>
    %132 = vector.shape_cast %131 : vector<1x64xf32> to vector<64xf32>
    %133 = vector.shape_cast %132 : vector<64xf32> to vector<1x1x64xf32>
    %134 = vector.broadcast %133 : vector<1x1x64xf32> to vector<4x8x64xf32>
    %135 = arith.mulf %116, %134 : vector<4x8x64xf32>
    %136 = arith.addf %130, %135 : vector<4x8x64xf32>
    %c0_38 = arith.constant 0 : index
    %c0_39 = arith.constant 0 : index
    %137 = vector.load %arg7[%c0_38, %c0_39] : memref<1x64xf32, #tpu.memory_space<vmem>>, vector<1x64xf32>
    %138 = vector.shape_cast %137 : vector<1x64xf32> to vector<1x1x64xf32>
    %139 = vector.broadcast %138 : vector<1x1x64xf32> to vector<4x8x64xf32>
    %140 = arith.addf %136, %139 : vector<4x8x64xf32>
    %cst_40 = arith.constant 5.000000e-01 : f32
    %141 = vector.broadcast %cst_40 : f32 to vector<4x8x64xf32>
    %142 = arith.mulf %141, %140 : vector<4x8x64xf32>
    %cst_41 = arith.constant 4.471500e-02 : f32
    %143 = vector.broadcast %cst_41 : f32 to vector<4x8x64xf32>
    %144 = arith.mulf %143, %140 : vector<4x8x64xf32>
    %145 = arith.mulf %144, %140 : vector<4x8x64xf32>
    %146 = arith.mulf %145, %140 : vector<4x8x64xf32>
    %147 = arith.addf %140, %146 : vector<4x8x64xf32>
    %cst_42 = arith.constant 0.797884583 : f32
    %148 = vector.broadcast %cst_42 : f32 to vector<4x8x64xf32>
    %149 = arith.mulf %148, %147 : vector<4x8x64xf32>
    %150 = math.tanh %149 : vector<4x8x64xf32>
    %cst_43 = arith.constant 1.000000e+00 : f32
    %151 = vector.broadcast %cst_43 : f32 to vector<4x8x64xf32>
    %152 = arith.addf %151, %150 : vector<4x8x64xf32>
    %153 = arith.mulf %142, %152 : vector<4x8x64xf32>
    %154 = vector.shape_cast %153 : vector<4x8x64xf32> to vector<32x64xf32>
    %c0_44 = arith.constant 0 : index
    %c0_45 = arith.constant 0 : index
    %155 = vector.load %arg8[%c0_44, %c0_45] : memref<64x64xf32, #tpu.memory_space<vmem>>, vector<64x64xf32>
    %cst_46 = arith.constant dense<0.000000e+00> : vector<32x64xf32>
    %156 = tpu.matmul %154, %155, %cst_46 {dimension_numbers = #tpu.dot_dimension_numbers<[1], [0], [0], [1], [0, 0, 1, 1], [], []>} : vector<32x64xf32>, vector<64x64xf32>, vector<32x64xf32> -> vector<32x64xf32>
    %c0_47 = arith.constant 0 : index
    %c0_48 = arith.constant 0 : index
    %157 = vector.load %arg9[%c0_47, %c0_48] : memref<1x64xf32, #tpu.memory_space<vmem>>, vector<1x64xf32>
    %158 = vector.broadcast %157 : vector<1x64xf32> to vector<32x64xf32>
    %159 = arith.addf %156, %158 : vector<32x64xf32>
    %160 = vector.shape_cast %159 : vector<32x64xf32> to vector<4x8x64xf32>
    %c0_49 = arith.constant 0 : index
    %c0_50 = arith.constant 0 : index
    %c0_51 = arith.constant 0 : index
    %c0_52 = arith.constant 0 : index
    %161 = vector.load %arg10[%c0_49, %c0_50, %c0_51, %c0_52] : memref<1x4x8x64xf32, #tpu.memory_space<vmem>>, vector<1x4x8x64xf32>
    %162 = vector.shape_cast %161 : vector<1x4x8x64xf32> to vector<4x8x64xf32>
    %163 = vector.shape_cast %160 : vector<4x8x64xf32> to vector<1x4x8x64xf32>
    tpu.vector_store %arg10[%c0_49, %c0_50, %c0_51, %c0_52], %163 {strides = array<i32>} : memref<1x4x8x64xf32, #tpu.memory_space<vmem>>, vector<1x4x8x64xf32>,
    return
  }
  func.func @transform_0(%arg0: i32, %arg1: i32) -> (i32, i32, i32, i32, i32) {
    %c0_i32 = arith.constant 0 : i32
    %c0_i32_0 = arith.constant 0 : i32
    %c0_i32_1 = arith.constant 0 : i32
    %c0_i32_2 = arith.constant 0 : i32
    return %arg0, %arg1, %c0_i32, %c0_i32_0, %c0_i32_1 : i32, i32, i32, i32, i32
  }
  func.func @transform_1(%arg0: i32, %arg1: i32) -> (i32, i32, i32, i32, i32) {
    %c4_i32 = arith.constant 4 : i32
    %0 = arith.muli %arg1, %c4_i32 : i32
    %c1_i32 = arith.constant 1 : i32
    %1 = arith.subi %0, %c1_i32 : i32
    %c0_i32 = arith.constant 0 : i32
    %2 = arith.maxsi %1, %c0_i32 : i32
    %c1_i32_0 = arith.constant 1 : i32
    %c0_i32_1 = arith.constant 0 : i32
    %c0_i32_2 = arith.constant 0 : i32
    %c0_i32_3 = arith.constant 0 : i32
    return %arg0, %2, %c1_i32_0, %c0_i32_1, %c0_i32_2 : i32, i32, i32, i32, i32
  }
  func.func @transform_2(%arg0: i32, %arg1: i32) -> (i32, i32) {
    %c0_i32 = arith.constant 0 : i32
    %c0_i32_0 = arith.constant 0 : i32
    %c0_i32_1 = arith.constant 0 : i32
    return %c0_i32, %c0_i32_0 : i32, i32
  }
  func.func @transform_3(%arg0: i32, %arg1: i32) -> (i32, i32) {
    %c0_i32 = arith.constant 0 : i32
    %c0_i32_0 = arith.constant 0 : i32
    %c0_i32_1 = arith.constant 0 : i32
    return %c0_i32, %c0_i32_0 : i32, i32
  }
  func.func @transform_4(%arg0: i32, %arg1: i32) -> (i32, i32) {
    %c0_i32 = arith.constant 0 : i32
    %c0_i32_0 = arith.constant 0 : i32
    %c0_i32_1 = arith.constant 0 : i32
    return %c0_i32, %c0_i32_0 : i32, i32
  }
  func.func @transform_5(%arg0: i32, %arg1: i32) -> (i32, i32) {
    %c0_i32 = arith.constant 0 : i32
    %c0_i32_0 = arith.constant 0 : i32
    %c0_i32_1 = arith.constant 0 : i32
    return %c0_i32, %c0_i32_0 : i32, i32
  }
  func.func @transform_6(%arg0: i32, %arg1: i32) -> (i32, i32) {
    %c0_i32 = arith.constant 0 : i32
    %c0_i32_0 = arith.constant 0 : i32
    %c0_i32_1 = arith.constant 0 : i32
    return %c0_i32, %c0_i32_0 : i32, i32
  }
  func.func @transform_7(%arg0: i32, %arg1: i32) -> (i32, i32) {
    %c0_i32 = arith.constant 0 : i32
    %c0_i32_0 = arith.constant 0 : i32
    %c0_i32_1 = arith.constant 0 : i32
    return %c0_i32, %c0_i32_0 : i32, i32
  }
  func.func @transform_8(%arg0: i32, %arg1: i32) -> (i32, i32, i32, i32) {
    %c0_i32 = arith.constant 0 : i32
    %c0_i32_0 = arith.constant 0 : i32
    %c0_i32_1 = arith.constant 0 : i32
    return %arg0, %arg1, %c0_i32, %c0_i32_0 : i32, i32, i32, i32
  }
}

</mosaic_0001>

<bundles_post_ra>
// kernel: tpu_custom_call.1
= control target key start
LH: loop header
LB: loop body
LE: loop exit
PB: predicated region body
PF: predicated region fallthrough
CT: control target
= control target key end

     0   :  { %s2556_s0 = inlined_call_operand.hbm [shape: f32[2,8,2,8,64], index: 0, kind: input, shape index: {}]   ;;  %s2557_s1 = inlined_call_operand.hbm [shape: f32[2,8,2,8,64], index: 1, kind: input, shape index: {}]   ;;  %s2558_s2 = inlined_call_operand.hbm [shape: f32[64,128], index: 2, kind: input, shape index: {}]   ;;  %s2559_s3 = inlined_call_operand.vmem [shape: f32[1,128], index: 3, kind: input, shape index: {}]   ;;  %s2560_s4 = inlined_call_operand.hbm [shape: f32[9,64], index: 4, kind: input, shape index: {}]   ;;  %s2561_s5 = inlined_call_operand.vmem [shape: f32[1,64], index: 5, kind: input, shape index: {}]   ;;  %s2562_s6 = inlined_call_operand.hbm [shape: f32[64,64], index: 6, kind: input, shape index: {}]   ;;  %s2563_s7 = inlined_call_operand.vmem [shape: f32[1,64], index: 7, kind: input, shape index: {}]   ;;  %s2564_s8 = inlined_call_operand.hbm [shape: f32[2,8,8,64], index: 8, kind: output, shape index: {}]  }
   0x1   :  { %2579 = sst [smem:[#allocation26_spill]] %s2556_s0 }
   0x2   :  { %2580 = sst [smem:[#allocation27_spill]] %s2558_s2 }
   0x3   :  { %2581 = sst [smem:[#allocation28_spill]] %s2560_s4 }
   0x4   :  { %2582 = sst [smem:[#allocation29_spill]] %s2562_s6 }
   0x5   :  { %2583 = sst [smem:[#allocation30_spill]] %s2563_s7 }
   0x6   :  { %2584 = sst [smem:[#allocation31_spill]] %s2564_s8 }
   0x7   :  { %13 = vsyncpa [#allocation3], 0 }
   0x8   :  { %15 = vsyncpa [#allocation3 + $0x1], 0 }
   0x9   :  { %16 = vsyncpa [#allocation6], 0 }
   0xa   :  { %18 = vsyncpa [#allocation6 + $0x1], 0 }
   0xb   :  { %19 = vsyncpa [#allocation9], 0 }
   0xc   :  { %20 = vsyncpa [#allocation4], 0 }
   0xd   :  { %22 = vsyncpa [#allocation4 + $0x1], 0  ;;  %s2066_s27 = smov 0   ;;  %s2068_s28 = smov 0  }
   0xe   :  { %s2070_s29 = smov 0   ;;  %s2072_s30 = smov 0  }
   0xf   :  { %s2074_s9 = smov 0   ;;  %s2076_s10 = smov 0  }
  0x10   :  { %s2078_s11 = smov 0   ;;  %s2080_s12 = smov 0  }
  0x11   :  { %s2082_s13 = smov 0   ;;  %s2084_s14 = smov 0  }
  0x12   :  { %s2086_s15 = smov 0  }
  0x13 LB: > { %2585 = sst [smem:[#allocation17_spill]] %s1978_s30  ;;  %s2122_s16 = sadd.s32 4294967295, %s2006_s15   ;;  %s2006_s15 = sphi %s2086_s15, %s28_s15   ;;  %s2002_s14 = sphi %s2084_s14, %s2635_s14   ;;  %s1998_s13 = sphi %s2082_s13, %s2627_s13   ;;  %s1994_s12 = sphi %s2080_s12, %s2634_s12   ;;  %s1990_s11 = sphi %s2078_s11, %s2626_s11   ;;  %s1986_s10 = sphi %s2076_s10, %s2625_s10   ;;  %s1982_s9 = sphi %s2074_s9, %s2633_s9   ;;  %s1978_s30 = sphi %s2072_s30, %s2632_s30   ;;  %s1974_s29 = sphi %s2070_s29, %s2631_s29   ;;  %s1970_s28 = sphi %s2068_s28, %s2630_s28   ;;  %s1966_s27 = sphi %s2066_s27, %s2629_s27  }
  0x14   : > { %2586 = sst [smem:[#allocation18_spill]] %s1986_s10  ;;  %s1378_s17 = sadd.s32 4294967294, %s2006_s15  }
  0x15   : > { %2587 = sst [smem:[#allocation19_spill]] %s1994_s12  ;;  %p62_p0 = scmp.ne.s32.totalorder %s1982_s9, %s1978_s30 }
  0x16   : > { %2588 = sst [smem:[#allocation20_spill]] %s1998_s13  ;;  %p2573_p1 = scmp.eq.s32.totalorder %s2122_s16, 0 }
  0x17   : > { %p256_p2 = scmp.eq.s32.totalorder %s1378_s17, 3  ;;  %p1383_p4 = scmp.ge.s32.totalorder %s2006_s15, 1 }
  0x18   : > { %p2130_p3 = por %p2573_p1, %p62_p0  ;;  %p263_p6 = scmp.lt.s32.totalorder %s2006_s15, 5 }
  0x19   : > { %p2135_p5 = por %p256_p2, %p62_p0  ;;  %s2008_s21 = smov [#allocation7]  }
  0x1a   : > { %p2140_p7 = pnand %p1383_p4, %p263_p6  ;;  %s275_s22 = sshll.u32 %s2008_s21, 4  ;;  %s276_s22 = int_to_ptr.vmem [resolvable:$true] %s275_s22 }
  0x1b   : > { %s2590_s19 = scalar_select %p2135_p5, 1, 0 }
  0x1c   : > { %p1586_p8 = pneg %p2140_p7  ;;  %s2009_s24 = smov [#allocation8]  }
  0x1d   : > { %2591 = sst [smem:[#allocation21_spill]] %s2590_s19  ;;  %s291_s25 = sshll.u32 %s2009_s24, 4  ;;  %s292_s25 = int_to_ptr.vmem [resolvable:$true] %s291_s25 }
  0x1e   : > { %p2148_p9 = pnand %p1586_p8, %p2573_p1  ;;  %s2010_s26 = smov [#allocation10]  }
  0x1f   : > { %s307_s17 = sshll.u32 %s2010_s26, 4  ;;  %s1750_s19 = scalar_lea.vmem %s276_s22, 1024  ;;  %s308_s17 = int_to_ptr.vmem [resolvable:$true] %s307_s17 }
  0x20   : > { %p1741_p10 = pneg %p2148_p9  ;;  %p1751_p11 = scmp.ne.s32.totalorder %s276_s22, %s1750_s19 }
  0x21   : > { %p1758_p0 = scmp.lt.s32.totalorder %s276_s22, %s276_s22  ;;  %p1759_p2 = scmp.lt.s32.totalorder %s1750_s19, %s1750_s19 }
  0x22   : > { %p1753_p12 = pnand %p1751_p11, %p1741_p10 }
  0x23   : > { %p1760_p4 = por %p1759_p2, %p1758_p0 }
  0x24   : > { %p1754_p13 = pneg %p1753_p12 }
  0x26   : > { %p1761_p6 = pnand %p1760_p4, %p1754_p13 }
  0x28   : > { %1764 = shalt.err (!%p1761_p6)
}
  0x29   : > { %s2568_s21 = smov 128   ;;  %s2569_s24 = smov 8  }
  0x2a   : > { %s2594_s2 = sld [smem:[#allocation27_spill]]  ;;  %s1776_s8 = scalar_lea.vmem %s292_s25, 256 }
  0x2b   : > { %p1777_p8 = scmp.ne.s32.totalorder %s292_s25, %s1776_s8  ;;  %p1784_p13 = scmp.lt.s32.totalorder %s292_s25, %s292_s25 }
  0x2c   : > { %p1785_p0 = scmp.lt.s32.totalorder %s1776_s8, %s1776_s8 }
  0x2d   : > { %p1779_p11 = pnand %p1777_p8, %p1741_p10 }
  0x2e   : > { %p1786_p2 = por %p1785_p0, %p1784_p13 }
  0x2f   : > { %p1780_p12 = pneg %p1779_p11 }
  0x30   : > { %1589 = dma.hbm_to_vmem [thread:$0]  (!%p2148_p9), %s2594_s2, 1024, %s276_s22, [#allocation6], %s2568_s21, %s2568_s21, %s2569_s24  }
  0x31   : > { %p1787_p4 = pnand %p1786_p2, %p1780_p12 }
  0x33   : > { %1790 = shalt.err (!%p1787_p4)
}
  0x34   : > { %s2595_s4 = sld [smem:[#allocation28_spill]]  ;;  %s1802_s30 = scalar_lea.vmem %s308_s17, 1024 }
  0x35   : > { %p1803_p6 = scmp.ne.s32.totalorder %s308_s17, %s1802_s30  ;;  %p1810_p13 = scmp.lt.s32.totalorder %s308_s17, %s308_s17 }
  0x36   : > { %p1811_p12 = scmp.lt.s32.totalorder %s1802_s30, %s1802_s30 }
  0x37   : > { %p1805_p8 = pnand %p1803_p6, %p1741_p10 }
  0x38   : > { %p1812_p0 = por %p1811_p12, %p1810_p13 }
  0x39   : > { %p1806_p11 = pneg %p1805_p8 }
  0x3a   : > { %1592 = dma.hbm_to_vmem [thread:$0]  (!%p2148_p9), %s2595_s4, 256, %s292_s25, [#allocation9], %s2568_s21, %s2568_s21, %s2569_s24  }
  0x3b   : > { %p1813_p2 = pnand %p1812_p0, %p1806_p11 }
  0x3d   : > { %1816 = shalt.err (!%p1813_p2)
}
  0x3e   : > { %s2596_s6 = sld [smem:[#allocation29_spill]]  ;;  %p250_p10 = scmp.eq.s32.totalorder %s2122_s16, 3 }
  0x3f   : > { %p56_p4 = scmp.ne.s32.totalorder %s1986_s10, %s1982_s9  ;;  %p2572_p6 = scmp.eq.s32.totalorder %s2006_s15, 0 }
  0x40   : > { %p1610_p8 = scmp.lt.s32.totalorder %s2006_s15, 4  ;;  %s324_s25 = sand.u32 1, %s1986_s10  }
  0x41   : > { %p2193_p11 = por %p250_p10, %p56_p4  ;;  %p58_p13 = por %p2572_p6, %p56_p4 }
  0x42   : > { %s1388_s26 = sshll.u32 %s324_s25, 6  ;;  %s1437_s19 = sshll.u32 %s1998_s13, 3 }
  0x43   : > { %s2597_s23 = scalar_select %p2193_p11, 1, 0 }
  0x44   : > { %1595 = dma.hbm_to_vmem [thread:$0]  (!%p2148_p9), %s2596_s6, 1024, %s308_s17, [#allocation9], %s2568_s21, %s2568_s21, %s2569_s24  }
  0x45   : > { %2598 = sst [smem:[#allocation22_spill]] %s2597_s23  ;;  %s1391_s30 = sshll.u32 %s2002_s14, 4 }
  0x46   : > { %s335_s7 = sadd.s32 %s1437_s19, %s1391_s30  ;;  %s328_s17 = scalar_lea.vmem [#allocation2], %s1388_s26 }
  0x47   : > { %s338_s8 = sshll.u32 %s328_s17, 4  ;;  %s1392_s22 = sshll.u32 %s335_s7, 7  ;;  %s339_s8 = int_to_ptr.vmem [resolvable:$true] %s338_s8 }
  0x48   : > { %s2599_s0 = sld [smem:[#allocation26_spill]]  ;;  %p2209_p9 = pnand %p1610_p8, %p58_p13 }
  0x49   : > { %s49_s6 = sadd.s32 1, %s1986_s10  ;;  %s325_s23 = scalar_lea.sflag [#allocation3], %s324_s25 }
  0x4a   : > { %p1819_p12 = pneg %p2209_p9  ;;  %s1830_s12 = scalar_lea.vmem %s339_s8, 1024 }
  0x4b   : > { %p1831_p0 = scmp.ne.s32.totalorder %s339_s8, %s1830_s12  ;;  %s2013_s26 = smov [#allocation2]  }
  0x4c   : > { %s1835_s19 = sshll.u32 %s2013_s26, 4  ;;  %s1836_s19 = int_to_ptr.vmem [resolvable:$false] %s1835_s19 }
  0x4d   : > { %p1833_p2 = pnand %p1831_p0, %p1819_p12  ;;  %s1837_s7 = scalar_lea.vmem %s1836_s19, 2048 }
  0x4e   : > { %s337_s2 = scalar_lea.hbm %s2599_s0, %s1392_s22  ;;  %p1838_p4 = scmp.lt.s32.totalorder %s339_s8, %s1836_s19 }
  0x4f   : > { %p1834_p10 = pneg %p1833_p2  ;;  %p1839_p6 = scmp.lt.s32.totalorder %s1837_s7, %s1830_s12 }
  0x51   : > { %p1840_p1 = por %p1839_p6, %p1838_p4 }
  0x53   : > { %p1841_p13 = pnand %p1840_p1, %p1834_p10 }
  0x55   : > { %1844 = shalt.err (!%p1841_p13)
}
  0x56   : > { %s2601_s21 = smov 8   ;;  %s2602_s24 = smov 128  }
  0x57   : > { %1599 = dma.hbm_to_vmem [thread:$0]  (!%p2209_p9), %s337_s2, 1024, %s339_s8, %s325_s23, %s2602_s24, %s2602_s24, %s2601_s21  }
  0x58   : > { %s37_s22 = sadd.s32 1, %s1998_s13  ;;  %s1379_s12 = sshll.u32 %s1998_s13, 2 }
  0x59   : > { %p38_p12 = scmp.ge.s32.totalorder %s37_s22, 2  ;;  %s1380_s25 = sadd.s32 4294967295, %s1379_s12 }
  0x5a   : > { %s2604_s4 = sadd.s32 1, %s2002_s14  ;;  %p74_p1 = scmp.gt.s32.totalorder %s1380_s25, 0 }
  0x5b   : > { %s2637_s22 = smov (%p38_p12, %s37_s22), 0  ;;  %s2639_s4 = smov (!%p38_p12, %s2604_s4), %s2002_s14 }
  0x5c   : > { %2603 = sst [smem:[#allocation23_spill]] %s2637_s22  ;;  %s45_s17 = ssub.s32 %s1998_s13, %s2637_s22 }
  0x5d   : > { %p42_p6 = scmp.ge.s32.totalorder %s2639_s4, 2  ;;  %s1381_s2 = sshll.u32 %s2637_s22, 2 }
  0x5e   : > { %s2641_s25 = smov (!%p74_p1, %s1380_s25), 0  ;;  %s1382_s23 = sadd.s32 4294967295, %s1381_s2 }
  0x5f   : > { %s2643_s4 = smov (%p42_p6, %s2639_s4), 0  ;;  %s85_s8 = sadd.s32 1, %s1974_s29 }
  0x60   : > { %2605 = sst [smem:[#allocation24_spill]] %s2643_s4  ;;  %s44_s26 = ssub.s32 %s2002_s14, %s2643_s4 }
  0x61   : > { %p78_p9 = scmp.gt.s32.totalorder %s1382_s23, 0  ;;  %s46_s19 = sor.u32 %s45_s17, %s44_s26 }
  0x62   : > { %p92_p0 = scmp.ne.s32.totalorder %s1974_s29, %s1970_s28  ;;  %p47_p2 = scmp.eq.s32.totalorder %s46_s19, 0 }
  0x63   : > { %p98_p10 = scmp.ne.s32.totalorder %s1970_s28, %s1966_s27  ;;  %s2645_s23 = smov (!%p78_p9, %s1382_s23), 0 }
  0x64   : > { %s2243_s7 = scalar_select %p47_p2, %s1986_s10, %s49_s6  }
  0x65   : > { %s81_s21 = ssub.s32 %s2641_s25, %s2645_s23  ;;  %p2607_p4 = scmp.eq.s32.totalorder %s2122_s16, 0 }
  0x66   : > { %2606 = sst [smem:[#allocation25_spill]] %s2243_s7  ;;  %s82_s12 = sor.u32 %s81_s21, %s44_s26 }
  0x67   : > { %p2247_p13 = por %p98_p10, %p2607_p4  ;;  %p2609_p12 = scmp.eq.s32.totalorder %s2006_s15, 0 }
  0x68   : > { %p83_p6 = scmp.eq.s32.totalorder %s82_s12, 0  ;;  %s348_s27 = sand.u32 1, %s2006_s15  }
  0x69   : > { %p2253_p1 = por %p92_p0, %p2609_p12  ;;  %s350_s17 = sand.u32 1, %s1974_s29  }
  0x6a   : > { %s1396_s19 = sshll.u32 %s2641_s25, 1  ;;  %s1393_s23 = sshll.u32 %s350_s17, 3 }
  0x6b   : > { %s2260_s6 = scalar_select %p83_p6, %s1974_s29, %s85_s8  }
  0x6c   : > { %s1276_s0 = sadd.s32 %s1396_s19, %s1391_s30  ;;  %s352_s21 = scalar_lea.vmem [#allocation5], %s1393_s23 }
  0x6d   : > { %s1398_s4 = sshll.u32 %s1276_s0, 7  ;;  %s367_s7 = sshll.u32 %s352_s21, 4  ;;  %s368_s7 = int_to_ptr.vmem [resolvable:$true] %s367_s7 }
  0x6e   : > { %s1278_s26 = scalar_lea.hbm %s2557_s1, %s1398_s4  ;;  %p2271_p9 = pnand %p1610_p8, %p2253_p1 }
  0x6f   : > { %s1279_s10 = scalar_lea.hbm %s1278_s26, 128  ;;  %s349_s25 = scalar_lea.sflag [#allocation6], %s348_s27 }
  0x70   : > { %p1847_p0 = pneg %p2271_p9  ;;  %s1858_s30 = scalar_lea.vmem %s368_s7, 128 }
  0x71   : > { %p1859_p2 = scmp.ne.s32.totalorder %s368_s7, %s1858_s30  ;;  %s2014_s0 = smov [#allocation5]  }
  0x72   : > { %s1863_s13 = sshll.u32 %s2014_s0, 4  ;;  %s1864_s13 = int_to_ptr.vmem [resolvable:$false] %s1863_s13 }
  0x73   : > { %p1861_p10 = pnand %p1859_p2, %p1847_p0  ;;  %s1865_s22 = scalar_lea.vmem %s1864_s13, 256 }
  0x74   : > { %p1866_p12 = scmp.lt.s32.totalorder %s368_s7, %s1864_s13  ;;  %p1867_p6 = scmp.lt.s32.totalorder %s1865_s22, %s1858_s30 }
  0x75   : > { %p1862_p4 = pneg %p1861_p10 }
  0x76   : > { %p1868_p5 = por %p1867_p6, %p1866_p12 }
  0x78   : > { %p1869_p11 = pnand %p1868_p5, %p1862_p4 }
  0x7a   : > { %1872 = shalt.err (!%p1869_p11)
}
  0x7b   : > { %1602 = dma.hbm_to_vmem [thread:$0]  (!%p2271_p9), %s1279_s10, 128, %s368_s7, %s349_s25  }
  0x7c   : > { %376 = sbr.rel (%p2140_p7) target bundleno = 785 (0x311), region = 52  ;;  %s2282_s4 = sand.u32 (!%p2140_p7), 1, %s1982_s9  }
  0x7d   : > { %s1400_s8 = sshll.u32 (!%p2140_p7), %s2282_s4, 6  ;;  %s379_s2 = scalar_lea.sflag (!%p2140_p7), [#allocation3], %s2282_s4 }
  0x7e   : > { %s2286_s27 = scalar_lea.vmem (!%p2140_p7), [#allocation2], %s1400_s8 }
  0x81   : > { %1945 = dma.done.wait (%p2130_p3), %s379_s2, 1024  }
  0x82   : > { %1947 = vsyncadd (%p2130_p3), %s379_s2, 4294966272  ;;  %s387_s10 = sand.u32 1, %s2122_s16   ;;  %s389_s20 = sand.u32 1, %s1970_s28  }
  0x83   : > { %s2294_s7 = sshll.u32 %s389_s20, 3  ;;  %s388_s17 = scalar_lea.sflag [#allocation6], %s387_s10 }
  0x84   : > { %s391_s19 = scalar_lea.vmem [#allocation5], %s2294_s7 }
  0x85   : > { %1949 = dma.done.wait (%p2247_p13), %s388_s17, 128  }
  0x86   : > { %1951 = vsyncadd (%p2247_p13), %s388_s17, 4294967168  ;;  %p2612_p5 = scmp.eq.s32.totalorder %s2122_s16, 0 }
  0x88   : > { %1953 = dma.done.wait (%p2612_p5), [#allocation6], 1024   ;;  %p2613_p3 = pmov %p2612_p5 }
  0x8a   : > { %1955 = vsyncadd (%p2613_p3), [#allocation6], 4294966272  ;;  %p2614_p7 = pmov %p2613_p3 }
  0x8b   : > { %p2615_p8 = pmov %p2613_p3 }
  0x8c   : > { %1957 = dma.done.wait (%p2614_p7), [#allocation9], 1280  }
  0x8d   : > { %1959 = vsyncadd (%p2615_p8), [#allocation9], 4294966016  ;;  %v454_v0 = vld [vmem:[#allocation7 + $0x38] sm:$0xff]  ;;  %v453_v1 = vld [vmem:[#allocation7 + $0x30] sm:$0xff]  ;;  %vm471_vm0 = vcmask 523264   ;;  %v2015_v15 = vmov 0.0  }
  0x8e   : > { %1483 = vmatprep.subr.mxu0 %v454_v0  ;;  %1505 = vmatprep.subr.mxu1 %v454_v0  ;;  %v452_v2 = vld [vmem:[#allocation7 + $0x28] sm:$0xff]  ;;  %v451_v3 = vld [vmem:[#allocation7 + $0x20] sm:$0xff]  ;;  %v450_v4 = vld [vmem:[#allocation7 + $0x18] sm:$0xff]  ;;  %s2016_s16 = smov 64   ;;  %vm2017_vm1 = vmmov 0   ;;  %p820_p11 = scmp.gt.s32.totalorder %s1990_s11, 0 }
  0x8f   : > { %1484 = vmatpush3.msra.mxu0 %v454_v0  ;;  %1506 = vmatpush3.msra.mxu1 %v454_v0  ;;  %v449_v5 = vld [vmem:[#allocation7 + $0x10] sm:$0xff]  ;;  %v448_v6 = vld [vmem:[#allocation7 + $0x8] sm:$0xff]  ;;  %v447_v7 = vld [vmem:[#allocation7] sm:$0xff]  ;;  %vm845_vm2 = vcmask 1040384   ;;  %s2616_s25 = sld [smem:[#allocation19_spill]]  ;;  %s1405_s30 = sshll.u32 %s2282_s4, 5 }
  0x90   : > { %1485 = vmatprep.subr.mxu0 %v453_v1  ;;  %1507 = vmatprep.subr.mxu1 %v453_v1  ;;  %v456_v8 = vld [vmem:[%s2286_s27] sm:$0xff]  ;;  %v457_v9 = vld [vmem:[%s2286_s27 + $0x8] sm:$0xff]  ;;  %v458_v10 = vld [vmem:[%s2286_s27 + $0x10] sm:$0xff]  ;;  %s821_s23 = scalar_select %p820_p11, 1, 0 }
  0x91   : > { %1486 = vmatpush3.msra.mxu0 %v453_v1  ;;  %1508 = vmatpush3.msra.mxu1 %v453_v1  ;;  %v459_v11 = vld [vmem:[%s2286_s27 + $0x18] sm:$0xff]  ;;  %v460_v12 = vld [vmem:[%s2286_s27 + $0x20] sm:$0xff]  ;;  %v461_v13 = vld [vmem:[%s2286_s27 + $0x28] sm:$0xff]  ;;  %s2617_s22 = sld [smem:[#allocation30_spill]]  ;;  %s1432_s8 = sshll.u32 %s1990_s11, 2 }
  0x92   : > { %1487 = vmatprep.subr.mxu0 %v452_v2  ;;  %1509 = vmatprep.subr.mxu1 %v452_v2  ;;  %v1418_v14 = vld [vmem:[#allocation8 + $0x2] ss:$0 sm:$0xff]  ;;  %v463_v16 = vld [vmem:[%s2286_s27 + $0x38] sm:$0xff]  ;;  %v1421_v19 = vld [vmem:[#allocation8 + $0x5] ss:$0 sm:$0xff]  ;;  %s822_s26 = scvt.s32.f32 %s821_s23  ;;  %s440_s10 = scalar_lea.vmem [#allocation11], %s1405_s30 }
  0x93   : > { %1488 = vmatpush3.msra.mxu0 %v452_v2  ;;  %1510 = vmatpush3.msra.mxu1 %v452_v2  ;;  %v462_v17 = vld [vmem:[%s2286_s27 + $0x30] sm:$0xff]  ;;  %v1424_v18 = vld [vmem:[#allocation8 + $0x8] ss:$0 sm:$0xff]  ;;  %v464_v20 = vld [vmem:[%s391_s19] sm:$0xff]  ;;  %s1232_s20 = sshll.u32 %s440_s10, 4  ;;  %s2618_s7 = sld [smem:[#allocation22_spill]]  ;;  %s2486_s20 = int_to_ptr.vmem [resolvable:$true] %s1232_s20 }
  0x94   : > { %1489 = vmatprep.subr.mxu0 %v451_v3  ;;  %1511 = vmatprep.subr.mxu1 %v451_v3  ;;  %v1406_v21 = vld [vmem:[%s2559_s3] ss:$0 sm:$0xff]  ;;  %s1217_s24 = scalar_lea.sflag [#allocation4], %s2282_s4  ;;  %s1874_s23 = scalar_lea.vmem %s2486_s20, 512 }
  0x95   : > { %1490 = vmatpush3.msra.mxu0 %v451_v3  ;;  %1512 = vmatpush3.msra.mxu1 %v451_v3  ;;  %s1433_s2 = sshll.u32 %s2616_s25, 3  ;;  %p1875_p13 = scmp.ne.s32.totalorder %s2486_s20, %s1874_s23 }
  0x96   : > { %1491 = vmatprep.subr.mxu0 %v450_v4  ;;  %1513 = vmatprep.subr.mxu1 %v450_v4  ;;  %s1229_s27 = sadd.s32 %s1433_s2, %s1432_s8 }
  0x97   : > { %1492 = vmatpush3.msra.mxu0 %v450_v4  ;;  %1514 = vmatpush3.msra.mxu1 %v450_v4  ;;  %s1434_s17 = sshll.u32 %s1229_s27, 7 }
  0x98   : > { %1493 = vmatprep.subr.mxu0 %v449_v5  ;;  %1515 = vmatprep.subr.mxu1 %v449_v5 }
  0x99   : > { %1494 = vmatpush3.msra.mxu0 %v449_v5  ;;  %1516 = vmatpush3.msra.mxu1 %v449_v5  ;;  %p2620_p1 = scmp.ne.s32.totalorder %s2618_s7, 0 }
  0x9a   : > { %1495 = vmatprep.subr.mxu0 %v448_v6  ;;  %1517 = vmatprep.subr.mxu1 %v448_v6 }
  0x9b   : > { %1496 = vmatpush3.msra.mxu0 %v448_v6  ;;  %1518 = vmatpush3.msra.mxu1 %v448_v6  ;;  %p1876_p9 = pnand %p1875_p13, %p2620_p1 }
  0x9c   : > { %1497 = vmatprep.subr.mxu0 %v447_v7  ;;  %1519 = vmatprep.subr.mxu1 %v447_v7 }
  0x9d   : > { %1498 = vmatpush3.msra.mxu0 %v447_v7  ;;  %1499 = vmatprep.mubr.msk.f32.mxu0 %vm471_vm0, %v456_v8  ;;  %p1877_p0 = pneg %p1876_p9 }
  0x9e   : > { %1520 = vmatpush3.msra.mxu1 %v447_v7  ;;  %1521 = vmatprep.mubr.msk.f32.mxu1 %vm471_vm0, %v457_v9 }
  0x9f   : > { %1500 = vmatmul.mubr.msk.f32.vlgmr.msra.gmra.mxu0 %vm471_vm0, %v458_v10  ;;  %1522 = vmatmul.mubr.msk.f32.vlgmr.msra.gmra.mxu1 %vm471_vm0, %v459_v11 }
  0xa0   : > { %1527 = vmatprep.subr.mxu0 %v2015_v15  ;;  %1502 = vmatprep.mubr.msk.f32.mxu0 %vm471_vm0, %v460_v12 }
  0xa1   : > { %1528 = vmatpush3.msra.mxu0 %v454_v0  ;;  %1524 = vmatprep.mubr.msk.f32.mxu1 %vm471_vm0, %v461_v13 }
  0xa2   : > { %1529 = vmatprep.subr.mxu0 %v2015_v15  ;;  %878 = vrot.lane.b32.xlu0 %v1418_v14, %s2016_s16 }
  0xa3   : > { %1530 = vmatpush3.msra.mxu0 %v453_v1  ;;  %1525 = vmatmul.mubr.msk.f32.gmra.mxu1 %vm471_vm0, %v463_v16 }
  0xa4   : > { %1503 = vmatmul.mubr.msk.f32.gmra.mxu0 %vm471_vm0, %v462_v17  ;;  %1531 = vmatprep.subr.mxu0 %v2015_v15 }
  0xa5   : > { %1532 = vmatpush3.msra.mxu0 %v452_v2  ;;  %1543 = vmatprep.mubr.msk.f32.mxu0 %vm2017_vm1, %v2015_v15 }
  0xa6   : > { %1533 = vmatprep.subr.mxu0 %v2015_v15  ;;  %1026 = vrot.lane.b32.xlu1 %v1424_v18, %s2016_s16 }
  0xa7   : > { %1534 = vmatpush3.msra.mxu0 %v451_v3  ;;  %961 = vrot.lane.b32.xlu0 %v1421_v19, %s2016_s16 }
  0xa8   : > { %1535 = vmatprep.subr.mxu0 %v2015_v15 }
  0xa9   : > { %1536 = vmatpush3.msra.mxu0 %v450_v4 }
  0xaa   : > { %1537 = vmatprep.subr.mxu0 %v2015_v15 }
  0xab   : > { %1538 = vmatpush3.msra.mxu0 %v449_v5 }
  0xac   : > { %1539 = vmatprep.subr.mxu0 %v2015_v15 }
  0xad   : > { %1540 = vmatpush3.msra.mxu0 %v448_v6 }
  0xae   : > { %1541 = vmatprep.subr.mxu0 %v2015_v15 }
  0xaf   : > { %1542 = vmatpush3.msra.mxu0 %v447_v7 }
  0xb0   : > { %1544 = vmatmul.mubr.msk.f32.vlgmr.msra.gmra.mxu0 %vm471_vm0, %v464_v20 }
 0x15f   : > { %v1501_v22 = vpop.f32.mrf.mxu0  ;;  %v1523_v23 = vpop.f32.mrf.mxu1 }
 0x160   : > { %v2334_v24 = vadd.f32 %v1501_v22, %v1406_v21  ;;  %v2336_v25 = vadd.f32 %v1523_v23, %v1406_v21 }
 0x161   : > { %v550_v26 = vpop.f32.mrf.mxu0  ;;  %v683_v27 = vpop.f32.mrf.mxu1 }
 0x162   : > { %v574_v28 = vmul.f32 0.044715, %v2334_v24  ;;  %v707_v29 = vmul.f32 0.044715, %v2336_v25  ;;  %v2340_v30 = vadd.f32 %v1406_v21, %v550_v26  ;;  %v2342_v31 = vadd.f32 %v1406_v21, %v683_v27 }
 0x163   : > { %v1526_v32 = vpop.f32.mrf.mxu1  ;;  %v703_v22 = vmul.f32 0.5, %v2336_v25 }
 0x164   : > { %v578_v33 = vmul.f32 %v574_v28, %v2334_v24  ;;  %v711_v34 = vmul.f32 %v707_v29, %v2336_v25  ;;  %v573_v35 = vmul.f32 0.044715, %v2340_v30  ;;  %v1504_v36 = vpop.f32.mrf.mxu0  ;;  %v706_v37 = vmul.f32 0.044715, %v2342_v31 }
 0x165   : > { %v2348_v38 = vadd.f32 %v1504_v36, %v1406_v21  ;;  %v693_v39 = vpop.f32.mrf.mxu1  ;;  %v2363_v52 = vadd.f32 %v1526_v32, %v1406_v21  ;;  %v570_v29 = vmul.f32 0.5, %v2334_v24 }
 0x166   : > { %v582_v40 = vmul.f32 %v578_v33, %v2334_v24  ;;  %v715_v41 = vmul.f32 %v711_v34, %v2336_v25  ;;  %v577_v42 = vmul.f32 %v573_v35, %v2340_v30  ;;  %v560_v43 = vpop.f32.mrf.mxu0  ;;  %v710_v44 = vmul.f32 %v706_v37, %v2342_v31  ;;  %v879_v37 = vpop.permute.xlu0 %878 }
 0x167   : > { %v2354_v45 = vadd.f32 %v1406_v21, %v560_v43  ;;  %v2356_v46 = vadd.f32 %v1406_v21, %v693_v39  ;;  %v576_v50 = vmul.f32 0.044715, %v2348_v38  ;;  %v709_v63 = vmul.f32 0.044715, %v2363_v52 }
 0x168   : > { %v586_v47 = vadd.f32 %v582_v40, %v2334_v24  ;;  %v719_v48 = vadd.f32 %v715_v41, %v2336_v25  ;;  %v581_v49 = vmul.f32 %v577_v42, %v2340_v30  ;;  %v714_v51 = vmul.f32 %v710_v44, %v2342_v31 }
 0x169   : > { %v575_v53 = vmul.f32 0.044715, %v2354_v45  ;;  %v708_v59 = vmul.f32 0.044715, %v2356_v46  ;;  %v580_v61 = vmul.f32 %v576_v50, %v2348_v38  ;;  %v713_v6 = vmul.f32 %v709_v63, %v2363_v52 }
 0x16a   : > { %v590_v54 = vmul.f32 0.7978846, %v586_v47  ;;  %v723_v55 = vmul.f32 0.7978846, %v719_v48  ;;  %v585_v56 = vadd.f32 %v581_v49, %v2340_v30  ;;  %v718_v57 = vadd.f32 %v714_v51, %v2342_v31 }
 0x16b   : > { %v579_v58 = vmul.f32 %v575_v53, %v2354_v45  ;;  %v712_v1 = vmul.f32 %v708_v59, %v2356_v46  ;;  %v584_v4 = vmul.f32 %v580_v61, %v2348_v38  ;;  %v717_v14 = vmul.f32 %v713_v6, %v2363_v52 }
 0x16c   : > { %1713 = vtanh.f32 %v723_v55  ;;  %v589_v60 = vmul.f32 0.7978846, %v585_v56  ;;  %v722_v62 = vmul.f32 0.7978846, %v718_v57  ;;  %v702_v34 = vmul.f32 0.5, %v2342_v31 }
 0x16d   : > { %v583_v0 = vmul.f32 %v579_v58, %v2354_v45  ;;  %1715 = vtanh.f32 %v590_v54  ;;  %v716_v3 = vmul.f32 %v712_v1, %v2356_v46  ;;  %v588_v13 = vadd.f32 %v584_v4, %v2348_v38 }
 0x16e   : > { %1717 = vtanh.f32 %v722_v62  ;;  %v721_v19 = vadd.f32 %v717_v14, %v2363_v52  ;;  %v569_v31 = vmul.f32 0.5, %v2340_v30  ;;  %v704_v49 = vmul.f32 0.5, %v2356_v46  ;;  %v1027_v14 = vpop.permute.xlu1 %1026 }
 0x16f   : > { %v587_v2 = vadd.f32 %v583_v0, %v2354_v45  ;;  %1719 = vtanh.f32 %v589_v60  ;;  %v720_v8 = vadd.f32 %v716_v3, %v2356_v46  ;;  %v592_v17 = vmul.f32 0.7978846, %v588_v13 }
 0x170   : > { %v807_v5 = vpop.f32.mrf.mxu0  ;;  %v725_v36 = vmul.f32 0.7978846, %v721_v19  ;;  %v571_v30 = vmul.f32 0.5, %v2354_v45  ;;  %v823_v45 = vstv %s822_s26  ;;  %v572_v3 = vmul.f32 0.5, %v2348_v38  ;;  %s2018_s26 = smov [#allocation11]  }
 0x171   : > { %v591_v7 = vmul.f32 0.7978846, %v587_v2  ;;  %v808_v9 = vadd.f32 %v1406_v21, %v807_v5  ;;  %v724_v11 = vmul.f32 0.7978846, %v720_v8  ;;  %v962_v8 = vpop.permute.xlu0 %961  ;;  %s1878_s21 = sshll.u32 %s2018_s26, 4  ;;  %s1879_s21 = int_to_ptr.vmem [resolvable:$false] %s1878_s21 }
 0x172   : > { %v1545_v10 = vpop.f32.mrf.mxu0  ;;  %s1880_s12 = scalar_lea.vmem %s1879_s21, 1024  ;;  %p1881_p2 = scmp.lt.s32.totalorder %s2486_s20, %s1879_s21 }
 0x173   : > { %v812_v12 = vmul.f32 0.044715, %v808_v9  ;;  %1721 = vtanh.f32 %v591_v7  ;;  %v811_v60 = vmul.f32 0.5, %v808_v9  ;;  %p1882_p10 = scmp.lt.s32.totalorder %s1880_s12, %s1874_s23 }
 0x174   : > { %1723 = vtanh.f32 %v724_v11 }
 0x175   : > { %v813_v15 = vmul.f32 %v812_v12, %v808_v9  ;;  %1725 = vtanh.f32 %v592_v17  ;;  %p1883_p4 = por %p1882_p10, %p1881_p2 }
 0x177   : > { %v814_v16 = vmul.f32 %v813_v15, %v808_v9  ;;  %p1884_p12 = pnand %p1883_p4, %p1877_p0 }
 0x179   : > { %v1714_v18 = vpop.eup %1713  ;;  %v815_v20 = vadd.f32 %v814_v16, %v808_v9  ;;  %v705_v9 = vmul.f32 0.5, %v2363_v52 }
 0x17a   : > { %v731_v23 = vadd.f32 1.0, %v1714_v18  ;;  %v1716_v21 = vpop.eup %1715 }
 0x17b   : > { %v816_v26 = vmul.f32 0.7978846, %v815_v20  ;;  %v1718_v27 = vpop.eup %1717  ;;  %v598_v32 = vadd.f32 1.0, %v1716_v21  ;;  %v1107_v20 = vld [vmem:[#allocation10 + $0x38] sm:$0xff]  ;;  %v1104_v21 = vld [vmem:[#allocation10 + $0x20] sm:$0xff] }
 0x17c   : > { %v2383_v28 = vmul.f32 %v731_v23, %v703_v22  ;;  %v1720_v33 = vpop.eup %1719  ;;  %v730_v35 = vadd.f32 1.0, %v1718_v27  ;;  %1546 = vmatprep.subr.mxu1 %v1107_v20  ;;  %v1106_v22 = vld [vmem:[#allocation10 + $0x30] sm:$0xff]  ;;  %v1105_v23 = vld [vmem:[#allocation10 + $0x28] sm:$0xff] }
 0x17d   : > { %1727 = vtanh.f32 %v816_v26  ;;  %v2389_v40 = vmul.f32 %v598_v32, %v570_v29  ;;  %v597_v41 = vadd.f32 1.0, %v1720_v33  ;;  %1547 = vmatpush3.msra.mxu1 %v1107_v20  ;;  %v1103_v26 = vld [vmem:[#allocation10 + $0x18] sm:$0xff]  ;;  %v1102_v27 = vld [vmem:[#allocation10 + $0x10] sm:$0xff]  ;;  %v1101_v29 = vld [vmem:[#allocation10 + $0x8] sm:$0xff] }
 0x17e   : > { %v883_v25 = vmul.f32 %v879_v37, %v2383_v28  ;;  %v831_v39 = vrot.slane %v2383_v28, 7  ;;  %v2391_v42 = vmul.f32 %v730_v35, %v702_v34  ;;  %1729 = vtanh.f32 %v725_v36  ;;  %1548 = vmatprep.subr.mxu1 %v1106_v22  ;;  %v1100_v32 = vld [vmem:[#allocation10] sm:$0xff]  ;;  %v1416_v35 = vld [vmem:[#allocation8] ss:$0 sm:$0xff] }
 0x17f   : > { %v910_v47 = vrot.slane %v2389_v40, 7  ;;  %v2399_v48 = vmul.f32 %v597_v41, %v569_v31  ;;  %v965_v38 = vmul.f32 %v962_v8, %v2389_v40  ;;  %v1030_v18 = vmul.f32 %v1027_v14, %v2383_v28  ;;  %1549 = vmatpush3.msra.mxu1 %v1106_v22  ;;  %v1417_v41 = vld [vmem:[#allocation8 + $0x1] ss:$0 sm:$0xff]  ;;  %v1423_v22 = vld [vmem:[#allocation8 + $0x7] ss:$0 sm:$0xff] }
 0x180   : > { %v1722_v24 = vpop.eup %1721  ;;  %893 = vrot.lane.b32.xlu0 %v883_v25, %s2016_s16  ;;  %837 = vrot.lane.b32.xlu1 %v831_v39, %s2016_s16  ;;  %v830_v44 = vrot.slane %v2391_v42, 7  ;;  %v882_v58 = vmul.f32 %v879_v37, %v2391_v42  ;;  %v1029_v15 = vmul.f32 %v1027_v14, %v2391_v42 }
 0x181   : > { %v1724_v43 = vpop.eup %1723  ;;  %v599_v51 = vadd.f32 1.0, %v1722_v24  ;;  %v909_v54 = vrot.slane %v2399_v48, 7  ;;  %v964_v12 = vmul.f32 %v962_v8, %v2399_v48  ;;  %1550 = vmatprep.subr.mxu1 %v1105_v23 }
 0x182   : > { %v732_v50 = vadd.f32 1.0, %v1724_v43  ;;  %v1726_v46 = vpop.eup %1725  ;;  %1551 = vmatpush3.msra.mxu1 %v1105_v23 }
 0x183   : > { %v2409_v56 = vmul.f32 %v599_v51, %v571_v30  ;;  %v600_v63 = vadd.f32 1.0, %v1726_v46  ;;  %1552 = vmatprep.subr.mxu1 %v1104_v21  ;;  %v1420_v46 = vld [vmem:[#allocation8 + $0x4] ss:$0 sm:$0xff] }
 0x184   : > { %835 = vrot.lane.b32.xlu0 %v830_v44, %s2016_s16  ;;  %915 = vrot.lane.b32.xlu1 %v910_v47, %s2016_s16  ;;  %v2404_v53 = vmul.f32 %v732_v50, %v704_v49  ;;  %v866_v44 = vmul.f32 %v1417_v41, %v2383_v28  ;;  %v865_v49 = vmul.f32 %v1417_v41, %v2391_v42  ;;  %v1419_v50 = vld [vmem:[#allocation8 + $0x3] ss:$0 sm:$0xff] }
 0x185   : > { %v911_v59 = vrot.slane %v2409_v56, 7  ;;  %v2423_v5 = vmul.f32 %v600_v63, %v572_v3  ;;  %v966_v52 = vmul.f32 %v962_v8, %v2409_v56  ;;  %1553 = vmatpush3.msra.mxu1 %v1104_v21  ;;  %v948_v63 = vmul.f32 %v1420_v46, %v2389_v40 }
 0x186   : > { %v832_v55 = vrot.slane %v2404_v53, 7  ;;  %v884_v0 = vmul.f32 %v879_v37, %v2404_v53  ;;  %v1031_v17 = vmul.f32 %v1027_v14, %v2404_v53  ;;  %1554 = vmatprep.subr.mxu1 %v1103_v26 }
 0x187   : > { %v912_v10 = vrot.slane %v2423_v5, 7  ;;  %v967_v16 = vmul.f32 %v962_v8, %v2423_v5  ;;  %1555 = vmatpush3.msra.mxu1 %v1103_v26 }
 0x188   : > { %913 = vrot.lane.b32.xlu0 %v909_v54, %s2016_s16  ;;  %839 = vrot.lane.b32.xlu1 %v832_v55, %s2016_s16 }
 0x189   : > { %1556 = vmatprep.subr.mxu1 %v1102_v27 }
 0x18a   : > { %v1728_v57 = vpop.eup %1727  ;;  %1557 = vmatpush3.msra.mxu1 %v1102_v27 }
 0x18b   : > { %v818_v61 = vadd.f32 1.0, %v1728_v57  ;;  %v1730_v1 = vpop.eup %1729  ;;  %1558 = vmatprep.subr.mxu1 %v1101_v29 }
 0x18c   : > { %891 = vrot.lane.b32.xlu0 %v882_v58, %s2016_s16  ;;  %917 = vrot.lane.b32.xlu1 %v911_v59, %s2016_s16  ;;  %v733_v7 = vadd.f32 1.0, %v1730_v1 }
 0x18d   : > { %v819_v62 = vmul.f32 %v818_v61, %v811_v60  ;;  %1559 = vmatpush3.msra.mxu1 %v1101_v29  ;;  %v947_v29 = vmul.f32 %v1420_v46, %v2399_v48 }
 0x18e   : > { %v2431_v11 = vmul.f32 %v733_v7, %v705_v9  ;;  %1560 = vmatprep.subr.mxu1 %v1100_v32 }
 0x18f   : > { %v2418_v2 = vmul.f32 %v823_v45, %v819_v62  ;;  %1561 = vmatpush3.msra.mxu1 %v1100_v32  ;;  %v950_v32 = vmul.f32 %v1420_v46, %v2423_v5  ;;  %v1012_v5 = vmul.f32 %v1423_v22, %v2391_v42 }
 0x190   : > { %895 = vrot.lane.b32.xlu0 %v884_v0, %s2016_s16  ;;  %v989_v13 = vrot.slane %v2431_v11, 7  ;;  %v1032_v19 = vmul.f32 %v1027_v14, %v2431_v11  ;;  %v867_v14 = vmul.f32 %v1417_v41, %v2404_v53 }
 0x191   : > { %v829_v4 = vrot.slane %v2418_v2, 7  ;;  %v881_v6 = vmul.f32 %v879_v37, %v2418_v2  ;;  %v864_v40 = vmul.f32 %v1417_v41, %v2418_v2 }
 0x193   : > { %833 = vrot.lane.b32.xlu1 %v829_v4, %s2016_s16 }
 0x194   : > { %889 = vrot.lane.b32.xlu0 %v881_v6, %s2016_s16  ;;  %v949_v6 = vmul.f32 %v1420_v46, %v2409_v56 }
 0x197   : > { %919 = vrot.lane.b32.xlu1 %v912_v10, %s2016_s16 }
 0x198   : > { %974 = vrot.lane.b32.xlu0 %v965_v38, %s2016_s16 }
 0x19b   : > { %972 = vrot.lane.b32.xlu1 %v964_v12, %s2016_s16  ;;  %v1422_v12 = vld [vmem:[#allocation8 + $0x6] ss:$0 sm:$0xff] }
 0x19c   : > { %990 = vrot.lane.b32.xlu0 %v989_v13, %s2016_s16 }
 0x19f   : > { %976 = vrot.lane.b32.xlu1 %v966_v52, %s2016_s16 }
 0x1a0   : > { %1037 = vrot.lane.b32.xlu0 %v1029_v15, %s2016_s16 }
 0x1a3   : > { %978 = vrot.lane.b32.xlu1 %v967_v16, %s2016_s16 }
 0x1a4   : > { %1041 = vrot.lane.b32.xlu0 %v1031_v17, %s2016_s16 }
 0x1a7   : > { %1039 = vrot.lane.b32.xlu1 %v1030_v18, %s2016_s16 }
 0x1ab   : > { %1043 = vrot.lane.b32.xlu1 %v1032_v19, %s2016_s16  ;;  %s2619_s16 = sld [smem:[#allocation31_spill]] }
 0x1b1   : > { %s2493_s18 = scalar_lea.hbm %s2619_s16, %s1434_s17 }
 0x1f2   : > { %v894_v33 = vpop.permute.xlu0 %893  ;;  %v838_v34 = vpop.permute.xlu1 %837 }
 0x1f3   : > { %v848_v36 = vsel %vm845_vm2, 0.0, %v838_v34 }
 0x1f4   : > { %v857_v24 = vmul.f32 %v1416_v35, %v848_v36  ;;  %v1000_v18 = vmul.f32 %v1422_v12, %v848_v36 }
 0x1f6   : > { %v836_v37 = vpop.permute.xlu0 %835  ;;  %v916_v25 = vpop.permute.xlu1 %915  ;;  %v870_v30 = vadd.f32 %v866_v44, %v857_v24 }
 0x1f7   : > { %v847_v39 = vsel %vm845_vm2, 0.0, %v836_v37  ;;  %v926_v51 = vsel %vm845_vm2, 0.0, %v916_v25  ;;  %v1013_v37 = vmul.f32 %v1423_v22, %v2383_v28 }
 0x1f8   : > { %v856_v31 = vmul.f32 %v1416_v35, %v847_v39  ;;  %v935_v57 = vmul.f32 %v1419_v50, %v926_v51  ;;  %v903_v61 = vadd.f32 %v894_v33, %v870_v30 }
 0x1fa   : > { %v914_v43 = vpop.permute.xlu0 %913  ;;  %v840_v47 = vpop.permute.xlu1 %839  ;;  %v869_v54 = vadd.f32 %v865_v49, %v856_v31  ;;  %v999_v31 = vmul.f32 %v1422_v12, %v847_v39  ;;  %v1425_v39 = vld [vmem:[%s2561_s5] ss:$0 sm:$0xff] }
 0x1fb   : > { %v849_v0 = vsel %vm845_vm2, 0.0, %v840_v47  ;;  %v925_v13 = vsel %vm845_vm2, 0.0, %v914_v43 }
 0x1fc   : > { %v858_v7 = vmul.f32 %v1416_v35, %v849_v0  ;;  %v934_v19 = vmul.f32 %v1419_v50, %v925_v13  ;;  %v1001_v47 = vmul.f32 %v1422_v12, %v849_v0 }
 0x1fe   : > { %v892_v55 = vpop.permute.xlu0 %891  ;;  %v918_v58 = vpop.permute.xlu1 %917  ;;  %v871_v15 = vadd.f32 %v867_v14, %v858_v7 }
 0x1ff   : > { %v902_v59 = vadd.f32 %v892_v55, %v869_v54  ;;  %v927_v60 = vsel %vm845_vm2, 0.0, %v918_v58  ;;  %v1014_v54 = vmul.f32 %v1423_v22, %v2404_v53 }
 0x200   : > { %v936_v45 = vmul.f32 %v1419_v50, %v927_v60 }
 0x201   : > { %v939_v62 = vadd.f32 %v935_v57, %v902_v59 }
 0x202   : > { %v896_v1 = vpop.permute.xlu0 %895  ;;  %v940_v3 = vadd.f32 %v936_v45, %v903_v61 }
 0x203   : > { %v952_v4 = vadd.f32 %v948_v63, %v939_v62  ;;  %v904_v23 = vadd.f32 %v896_v1, %v871_v15  ;;  %v1015_v62 = vmul.f32 %v1423_v22, %v2431_v11 }
 0x204   : > { %v953_v9 = vadd.f32 %v949_v6, %v940_v3 }
 0x205   : > { %v834_v8 = vpop.permute.xlu1 %833 }
 0x206   : > { %v846_v10 = vsel %vm845_vm2, 0.0, %v834_v8  ;;  %v890_v38 = vpop.permute.xlu0 %889 }
 0x207   : > { %v855_v52 = vmul.f32 %v1416_v35, %v846_v10 }
 0x209   : > { %v868_v16 = vadd.f32 %v864_v40, %v855_v52  ;;  %v920_v17 = vpop.permute.xlu1 %919 }
 0x20a   : > { %v928_v56 = vsel %vm845_vm2, 0.0, %v920_v17  ;;  %v975_v20 = vpop.permute.xlu0 %974 }
 0x20b   : > { %v901_v21 = vadd.f32 %v890_v38, %v868_v16  ;;  %v937_v26 = vmul.f32 %v1419_v50, %v928_v56  ;;  %v985_v27 = vadd.f32 %v975_v20, %v952_v4 }
 0x20d   : > { %v938_v33 = vadd.f32 %v934_v19, %v901_v21  ;;  %v941_v34 = vadd.f32 %v937_v26, %v904_v23  ;;  %v1004_v2 = vadd.f32 %v1000_v18, %v985_v27  ;;  %v973_v35 = vpop.permute.xlu1 %972 }
 0x20e   : > { %v991_v36 = vpop.permute.xlu0 %990 }
 0x20f   : > { %v951_v25 = vadd.f32 %v947_v29, %v938_v33  ;;  %v954_v41 = vadd.f32 %v950_v32, %v941_v34  ;;  %v1017_v24 = vadd.f32 %v1013_v37, %v1004_v2  ;;  %v993_v48 = vsel %vm845_vm2, 0.0, %v991_v36 }
 0x210   : > { %v1002_v46 = vmul.f32 %v1422_v12, %v993_v48 }
 0x211   : > { %v984_v43 = vadd.f32 %v973_v35, %v951_v25  ;;  %v977_v44 = vpop.permute.xlu1 %976 }
 0x212   : > { %v986_v49 = vadd.f32 %v977_v44, %v953_v9  ;;  %v1038_v50 = vpop.permute.xlu0 %1037 }
 0x213   : > { %v1003_v51 = vadd.f32 %v999_v31, %v984_v43 }
 0x214   : > { %v1005_v30 = vadd.f32 %v1001_v47, %v986_v49  ;;  %v1426_v47 = vld [vmem:[%s2617_s22] ss:$0 sm:$0xff] }
 0x215   : > { %v1016_v55 = vadd.f32 %v1012_v5, %v1003_v51  ;;  %v979_v28 = vpop.permute.xlu1 %978 }
 0x216   : > { %v987_v57 = vadd.f32 %v979_v28, %v954_v41  ;;  %v1018_v58 = vadd.f32 %v1014_v54, %v1005_v30  ;;  %v1042_v59 = vpop.permute.xlu0 %1041 }
 0x217   : > { %v1049_v60 = vadd.f32 %v1038_v50, %v1016_v55 }
 0x218   : > { %v1006_v61 = vadd.f32 %v1002_v46, %v987_v57  ;;  %v1051_v45 = vadd.f32 %v1042_v59, %v1018_v58 }
 0x219   : > { %v1060_v63 = vadd.f32 %v1425_v39, %v1049_v60  ;;  %v1040_v42 = vpop.permute.xlu1 %1039 }
 0x21a   : > { %v1062_v0 = vadd.f32 %v1425_v39, %v1051_v45  ;;  %v1050_v1 = vadd.f32 %v1040_v42, %v1017_v24  ;;  %v1019_v53 = vadd.f32 %v1015_v62, %v1006_v61 }
 0x21b   : > { %v1068_v3 = vmul.f32 0.044715, %v1060_v63  ;;  %v1064_v29 = vmul.f32 0.5, %v1060_v63 }
 0x21c   : > { %v1070_v4 = vmul.f32 0.044715, %v1062_v0  ;;  %v1061_v6 = vadd.f32 %v1425_v39, %v1050_v1  ;;  %v1066_v36 = vmul.f32 0.5, %v1062_v0 }
 0x21d   : > { %v1072_v7 = vmul.f32 %v1068_v3, %v1060_v63  ;;  %v1044_v8 = vpop.permute.xlu1 %1043 }
 0x21e   : > { %v1074_v9 = vmul.f32 %v1070_v4, %v1062_v0  ;;  %v1069_v10 = vmul.f32 0.044715, %v1061_v6  ;;  %v1052_v38 = vadd.f32 %v1044_v8, %v1019_v53  ;;  %v1065_v35 = vmul.f32 0.5, %v1061_v6 }
 0x21f   : > { %v1076_v12 = vmul.f32 %v1072_v7, %v1060_v63 }
 0x220   : > { %v1078_v13 = vmul.f32 %v1074_v9, %v1062_v0  ;;  %v1073_v14 = vmul.f32 %v1069_v10, %v1061_v6  ;;  %v1063_v52 = vadd.f32 %v1425_v39, %v1052_v38 }
 0x221   : > { %v1080_v40 = vadd.f32 %v1076_v12, %v1060_v63 }
 0x222   : > { %v1077_v15 = vmul.f32 %v1073_v14, %v1061_v6  ;;  %v1071_v11 = vmul.f32 0.044715, %v1063_v52  ;;  %v1082_v16 = vadd.f32 %v1078_v13, %v1062_v0  ;;  %v1067_v31 = vmul.f32 0.5, %v1063_v52 }
 0x223   : > { %v1084_v17 = vmul.f32 0.7978846, %v1080_v40 }
 0x224   : > { %v1081_v18 = vadd.f32 %v1077_v15, %v1061_v6  ;;  %v1075_v19 = vmul.f32 %v1071_v11, %v1063_v52  ;;  %v1086_v56 = vmul.f32 0.7978846, %v1082_v16 }
 0x225   : > { %1731 = vtanh.f32 %v1084_v17 }
 0x226   : > { %v1085_v20 = vmul.f32 0.7978846, %v1081_v18  ;;  %v1079_v22 = vmul.f32 %v1075_v19, %v1063_v52  ;;  %1733 = vtanh.f32 %v1086_v56 }
 0x228   : > { %1735 = vtanh.f32 %v1085_v20  ;;  %v1083_v23 = vadd.f32 %v1079_v22, %v1063_v52 }
 0x22a   : > { %v1087_v21 = vmul.f32 0.7978846, %v1083_v23 }
 0x22c   : > { %1737 = vtanh.f32 %v1087_v21 }
 0x232   : > { %v1732_v26 = vpop.eup %1731 }
 0x233   : > { %v1734_v27 = vpop.eup %1733  ;;  %v1092_v32 = vadd.f32 1.0, %v1732_v26 }
 0x234   : > { %v1094_v2 = vadd.f32 1.0, %v1734_v27 }
 0x235   : > { %v1736_v33 = vpop.eup %1735  ;;  %v1096_v34 = vmul.f32 %v1092_v32, %v1064_v29 }
 0x236   : > { %v1093_v37 = vadd.f32 1.0, %v1736_v33  ;;  %v1098_v24 = vmul.f32 %v1094_v2, %v1066_v36 }
 0x237   : > { %1562 = vmatprep.mubr.msk.f32.mxu1 %vm471_vm0, %v1096_v34 }
 0x238   : > { %v1097_v25 = vmul.f32 %v1093_v37, %v1065_v35 }
 0x239   : > { %v1738_v41 = vpop.eup %1737 }
 0x23a   : > { %1563 = vmatmul.mubr.msk.f32.vlgmr.msra.gmra.mxu1 %vm471_vm0, %v1097_v25  ;;  %v1095_v43 = vadd.f32 1.0, %v1738_v41 }
 0x23b   : > { %1565 = vmatprep.mubr.msk.f32.mxu1 %vm471_vm0, %v1098_v24 }
 0x23c   : > { %v1099_v44 = vmul.f32 %v1095_v43, %v1067_v31 }
 0x23e   : > { %1566 = vmatmul.mubr.msk.f32.gmra.mxu1 %vm471_vm0, %v1099_v44 }
 0x2fa   : > { %v1564_v49 = vpop.f32.mrf.mxu1 }
 0x2fb   : > { %v1199_v50 = vadd.f32 %v1564_v49, %v1426_v47 }
 0x2fc   : > { %v1193_v51 = vpop.f32.mrf.mxu1 }
 0x2fd   : > { %1213 = vst.msk [vmem:[%s440_s10 + $0x8] sm:$0xff] %vm471_vm0, %v1199_v50  ;;  %v1194_v48 = vadd.f32 %v1426_v47, %v1193_v51 }
 0x2fe   : > { %v1567_v5 = vpop.f32.mrf.mxu1 }
 0x2ff   : > { %1212 = vst.msk [vmem:[%s440_s10] sm:$0xff] %vm471_vm0, %v1194_v48  ;;  %v1209_v30 = vadd.f32 %v1567_v5, %v1426_v47 }
 0x300   : > { %v1203_v54 = vpop.f32.mrf.mxu1 }
 0x301   : > { %1215 = vst.msk [vmem:[%s440_s10 + $0x18] sm:$0xff] %vm471_vm0, %v1209_v30  ;;  %v1204_v55 = vadd.f32 %v1426_v47, %v1203_v54 }
 0x303   : > { %1214 = vst.msk [vmem:[%s440_s10 + $0x10] sm:$0xff] %vm471_vm0, %v1204_v55 }
 0x304   : > { %1887 = shalt.err (!%p1884_p12)
}
 0x305   : > { %s1888_s25 = scalar_lea.hbm %s2493_s18, 512  ;;  %s1892_s13 = scalar_lea.hbm %s2619_s16, 2048 }
 0x306   : > { %p1889_p6 = scmp.ne.s32.totalorder %s2493_s18, %s1888_s25  ;;  %p1893_p7 = scmp.lt.s32.totalorder %s2493_s18, %s2619_s16 }
 0x307   : > { %p1894_p8 = scmp.lt.s32.totalorder %s1892_s13, %s1888_s25 }
 0x308   : > { %p1890_p5 = pnand %p1889_p6, %p2620_p1 }
 0x309   : > { %p1895_p11 = por %p1894_p8, %p1893_p7 }
 0x30a   : > { %p1891_p3 = pneg %p1890_p5 }
 0x30c   : > { %p1896_p13 = pnand %p1895_p11, %p1891_p3 }
 0x30e   : > { %1899 = shalt.err (!%p1896_p13)
}
 0x30f   : > { %s2019_s2 = smov 128   ;;  %s2020_s27 = smov 8  }
 0x310   : > { %1584 = dma.vmem_to_hbm [thread:$0]  (%p2620_p1), %s2486_s20, 512, %s2493_s18, %s1217_s24, %s2019_s2, %s2019_s2, %s2020_s27  }
 0x311 PF: > { %s2621_s10 = sld [smem:[#allocation17_spill]]  ;;  %p1614_p9 = scmp.ge.s32.totalorder %s2006_s15, 2 }
 0x312   : > { %s2622_s17 = sld [smem:[#allocation21_spill]] }
 0x317   : > { %s1247_s11 = sand.u32 1, %s2621_s10  }
 0x318   : > { %p2623_p0 = scmp.ne.s32.totalorder %s2622_s17, 0  ;;  %s1248_s19 = scalar_lea.sflag [#allocation4], %s1247_s11 }
 0x31a   : > { %p1604_p2 = pnand %p1614_p9, %p2623_p0 }
 0x31c   : > { %p1605_p10 = pneg %p1604_p2 }
 0x31e   : > { %1961 = dma.done.wait (%p1605_p10), %s1248_s19, 512  }
 0x31f   : > { %1963 = vsyncadd (%p1605_p10), %s1248_s19, 4294966784  ;;  %s28_s15 = sadd.s32 1, %s2006_s15   ;;  %s2624_s4 = sld [smem:[#allocation18_spill]] }
 0x320   : > { %p25_p4 = scmp.ge.s32.totalorder %s28_s15, 6   ;;  %s2625_s10 = sld [smem:[#allocation25_spill]] }
 0x321   : > { %s2626_s11 = sld [smem:[#allocation20_spill]]  ;;  %s2629_s27 = smov %s1970_s28 }
 0x322   : > { %s2627_s13 = sld [smem:[#allocation23_spill]]  ;;  %s2630_s28 = smov %s1974_s29 }
 0x323   : > { %s2628_s20 = sld [smem:[#allocation24_spill]]  ;;  %s2631_s29 = smov %s2260_s6 }
 0x324   : > { %s2632_s30 = smov %s1982_s9  ;;  %s2634_s12 = smov %s2002_s14 }
 0x325   : > { %s2633_s9 = smov %s2624_s4  ;;  %27 = sbr.rel (!%p25_p4) target bundleno = 19 (0x13), region = 122 }
 0x329   : > { %s2635_s14 = smov %s2628_s20 }
 0x32a   :  { %1253 = vsyncpa [#allocation3], 1 }
 0x32b   :  { %1255 = vsyncpa [#allocation3 + $0x1], 1 }
 0x32c   :  { %1256 = vsyncpa [#allocation6], 1 }
 0x32d   :  { %1258 = vsyncpa [#allocation6 + $0x1], 1 }
 0x32e   :  { %1259 = vsyncpa [#allocation9], 1 }
 0x32f   :  { %1260 = vsyncpa [#allocation4], 1 }
 0x330   :  { %1262 = vsyncpa [#allocation4 + $0x1], 1 }

</bundles_post_ra>
